<compile_context>
chip_gen: v7x
topology: tpu7x:2x2x1
jax: 0.10.0
libtpu: 0.0.40
codegen_flags: <defaults>
</compile_context>

<pallas_src>
import functools
import math

import jax
import jax.numpy as jnp
from jax.experimental import pallas as pl
from jax.experimental.pallas import tpu as pltpu


_VMEM = pl.BlockSpec(memory_space=pltpu.MemorySpace.VMEM)


# ----------------------------- kernels -----------------------------

def _layernorm(x, g, b, eps=1e-5):
    mu = jnp.mean(x, axis=-1, keepdims=True)
    var = jnp.mean((x - mu) ** 2, axis=-1, keepdims=True)
    return (x - mu) * jax.lax.rsqrt(var + eps) * g + b


def _transformer_encoder_kernel(
        # grid = (B, L); per-batch activation block, per-layer weight blocks
        x_ref, pe_ref, mask_ref,
        wq_ref, bq_ref, wk_ref, bk_ref, wv_ref, bv_ref,
        wo_ref, bo_ref, ln1g_ref, ln1b_ref,
        w1_ref, b1_ref, w2_ref, b2_ref, ln2g_ref, ln2b_ref,
        o_ref, x_acc,
        *, H, embed_scale):
    """All encoder layers for one batch; one grid step == one layer."""
    l = pl.program_id(1)
    n_layers = pl.num_programs(1)

    @pl.when(l == 0)
    def _():
        # embedding * sqrt(E) + positional encoding fused into layer-0 prologue
        x_acc[...] = x_ref[...] * embed_scale + pe_ref[...]

    x = x_acc[...]                       # (S, E) resident activation
    S, E = x.shape
    Dh = E // H
    scale = 1.0 / math.sqrt(Dh)

    # ----- multi-head self-attention: all heads via batched dot_generals -----
    x_b = jnp.broadcast_to(x[None, :, :], (H, S, E))     # major-dim broadcast
    qh = (jnp.einsum('hse,hde->hsd', x_b, wq_ref[...],
                     preferred_element_type=jnp.float32) + bq_ref[...]) * scale
    kh = jnp.einsum('hse,hde->hsd', x_b, wk_ref[...],
                    preferred_element_type=jnp.float32) + bk_ref[...]
    vh = jnp.einsum('hse,hde->hsd', x_b, wv_ref[...],
                    preferred_element_type=jnp.float32) + bv_ref[...]

    s = jnp.einsum('hqd,hkd->hqk', qh, kh,
                   preferred_element_type=jnp.float32) + mask_ref[...]
    mx = jnp.max(s, axis=-1, keepdims=True)
    p = jnp.exp(s - mx)
    p = p / jnp.sum(p, axis=-1, keepdims=True)           # exact softmax
    oh = jnp.einsum('hqk,hkd->hqd', p, vh,
                    preferred_element_type=jnp.float32)  # (H, S, Dh)

    # out-projection: one batched dot_general over heads + major-axis reduce
    # (equivalent to concat_heads @ Wo; no lane slicing of Wo or activations)
    attn = jnp.sum(jnp.einsum('hsd,hde->hse', oh, wo_ref[...],
                              preferred_element_type=jnp.float32),
                   axis=0) + bo_ref[...]

    # residual + LN1
    y = _layernorm(x + attn, ln1g_ref[...], ln1b_ref[...])
    # FFN (ReLU) + residual + LN2
    h1 = jnp.maximum(jnp.dot(y, w1_ref[...],
                             preferred_element_type=jnp.float32) + b1_ref[...], 0.0)
    h2 = jnp.dot(h1, w2_ref[...],
                 preferred_element_type=jnp.float32) + b2_ref[...]
    y = _layernorm(y + h2, ln2g_ref[...], ln2b_ref[...])

    x_acc[...] = y                       # stays resident for the next layer

    @pl.when(l == n_layers - 1)
    def _():
        o_ref[...] = y.astype(o_ref.dtype)


def _decoder_head_kernel(x_ref, wd_ref, bd_ref, wh_ref, bh_ref, o_ref):
    """Fused decoder Linear(E->ntokens) + classifier head Linear(ntokens->out)
    on the batch-0 slab; only the consumed row (seq=0) is emitted."""
    logits = jnp.dot(x_ref[...], wd_ref[...],
                     preferred_element_type=jnp.float32) + bd_ref[...]
    out = jnp.dot(logits, wh_ref[...],
                  preferred_element_type=jnp.float32) + bh_ref[...]
    o_ref[...] = out[0:1, :].astype(o_ref.dtype)


# ----------------------------- wrappers -----------------------------

_LAYER_PARAM_NAMES = ("wq", "bq", "wk", "bk", "wv", "bv", "wo", "bo",
                      "ln1_g", "ln1_b", "ff1_w", "ff1_b", "ff2_w", "ff2_b",
                      "ln2_g", "ln2_b")


def transformer_encoder(params, x_emb, pe, mask, *, nhead):
    B, S, E = x_emb.shape
    L = params["wq"].shape[0]
    layer_args = [params[n] for n in _LAYER_PARAM_NAMES]

    def layer_spec(arr):                 # leading layer axis, rest resident-full
        n_rest = arr.ndim - 1
        def imap(b, l):
            return (l,) + (0,) * n_rest
        return pl.BlockSpec((None,) + tuple(arr.shape[1:]), imap)

    in_specs = ([pl.BlockSpec((None, S, E), lambda b, l: (b, 0, 0)),   # x_emb
                 pl.BlockSpec((S, E), lambda b, l: (0, 0)),            # pe
                 pl.BlockSpec((S, S), lambda b, l: (0, 0))]            # mask
                + [layer_spec(a) for a in layer_args])

    kernel = functools.partial(_transformer_encoder_kernel,
                               H=nhead, embed_scale=math.sqrt(E))

    return pl.pallas_call(
        kernel,
        out_shape=jax.ShapeDtypeStruct((B, S, E), jnp.float32),
        grid=(B, L),
        in_specs=in_specs,
        out_specs=pl.BlockSpec((None, S, E), lambda b, l: (b, 0, 0)),
        scratch_shapes=[pltpu.VMEM((S, E), jnp.float32)],
        compiler_params=pltpu.CompilerParams(
            dimension_semantics=("parallel", "arbitrary")),
    )(x_emb, pe, mask, *layer_args)


def decoder_head(x0, wd, bd, wh, bh):
    return pl.pallas_call(
        _decoder_head_kernel,
        out_shape=jax.ShapeDtypeStruct((1, wh.shape[1]), jnp.float32),
        in_specs=[_VMEM] * 5,
        out_specs=_VMEM,
    )(x0, wd, bd, wh, bh)


# ----------------------------- model glue -----------------------------

def make_positional_encoding(max_len, emsize):
    position = jnp.arange(max_len, dtype=jnp.float32)[:, None]
    div_term = jnp.exp(jnp.arange(0, emsize, 2, dtype=jnp.float32)
                       * (-math.log(10000.0) / emsize))
    pe = jnp.zeros((max_len, emsize), dtype=jnp.float32)
    pe = pe.at[:, 0::2].set(jnp.sin(position * div_term))
    pe = pe.at[:, 1::2].set(jnp.cos(position * div_term))
    return pe


def init_params(key, ntokens, emsize, nhead, d_hid, nlayers, head_out):
    assert emsize % nhead == 0
    Dh = emsize // nhead

    def norm(k, shape, scale=0.02):
        return scale * jax.random.normal(k, shape, dtype=jnp.float32)

    keys = iter(jax.random.split(key, 16))
    params = {
        "embedding": norm(next(keys), (ntokens, emsize)),
        "pos_encoding": make_positional_encoding(512, emsize),
        "decoder_w": norm(next(keys), (emsize, ntokens)),
        "decoder_b": jnp.zeros((1, ntokens), jnp.float32),
        "head_w": norm(next(keys), (ntokens, head_out)),
        "head_b": jnp.zeros((1, head_out), jnp.float32),
        # Per-layer weights stacked on a leading layer axis; Q/K/V/out-proj are
        # stored head-major (L, H, Dh, E) so the kernel never slices lanes.
        "wq": norm(next(keys), (nlayers, nhead, Dh, emsize)),
        "bq": jnp.zeros((nlayers, nhead, 1, Dh), jnp.float32),
        "wk": norm(next(keys), (nlayers, nhead, Dh, emsize)),
        "bk": jnp.zeros((nlayers, nhead, 1, Dh), jnp.float32),
        "wv": norm(next(keys), (nlayers, nhead, Dh, emsize)),
        "bv": jnp.zeros((nlayers, nhead, 1, Dh), jnp.float32),
        "wo": norm(next(keys), (nlayers, nhead, Dh, emsize)),
        "bo": jnp.zeros((nlayers, 1, emsize), jnp.float32),
        "ln1_g": jnp.ones((nlayers, 1, emsize), jnp.float32),
        "ln1_b": jnp.zeros((nlayers, 1, emsize), jnp.float32),
        "ff1_w": norm(next(keys), (nlayers, emsize, d_hid)),
        "ff1_b": jnp.zeros((nlayers, 1, d_hid), jnp.float32),
        "ff2_w": norm(next(keys), (nlayers, d_hid, emsize)),
        "ff2_b": jnp.zeros((nlayers, 1, emsize), jnp.float32),
        "ln2_g": jnp.ones((nlayers, 1, emsize), jnp.float32),
        "ln2_b": jnp.zeros((nlayers, 1, emsize), jnp.float32),
    }
    return params


def training_block_forward(params, src_tokens, mask, *, nhead):
    """Mirrors training_block.forward(src, mask) -> {head_name: head_output}."""
    S, B = src_tokens.shape
    emb = params["embedding"]

    # Token embedding gather (plain JAX; data-dependent gather). Layout (B, S, E).
    x = jnp.take(emb, src_tokens.T, axis=0)
    pe = params["pos_encoding"][:S]                       # (S, E)

    x_out = transformer_encoder(params, x, pe, mask, nhead=nhead)   # (B, S, E)

    # classifierOutput.forward == Linear(ntokens, out)(output[0][0]);
    # output[seq=0][batch=0] -> batch-0 slab, row 0.  Only that slab is fed in
    # and only that row is computed/emitted.
    head = decoder_head(x_out[0], params["decoder_w"], params["decoder_b"],
                        params["head_w"], params["head_b"])          # (1, out)
    return {"head0": head[0]}


# ----------------------------------- main -----------------------------------

if __name__ == "__main__":
    ntokens, emsize, nhead, d_hid, nlayers = 32, 32, 4, 64, 2
    seq_len, batch = 8, 2
    head_out = 2

    key = jax.random.PRNGKey(0)
    kp, ks = jax.random.split(key)
    params = init_params(kp, ntokens, emsize, nhead, d_hid, nlayers, head_out)

    src = jax.random.randint(ks, (seq_len, batch), 0, ntokens, dtype=jnp.int32)
    # causal additive mask (generate_square_subsequent_mask), -1e9 instead of -inf
    causal = jnp.triu(jnp.ones((seq_len, seq_len), jnp.float32), k=1)
    mask = causal * (-1e9)

    fwd = jax.jit(training_block_forward, static_argnames=("nhead",))
    out = fwd(params, src, mask, nhead=nhead)
    jax.block_until_ready(out)

    assert out["head0"].shape == (head_out,)
    assert bool(jnp.all(jnp.isfinite(out["head0"])))
    print("KERNEL_OK")
</pallas_src>

<mosaic_0001>
module attributes {stable_mosaic.version = 11 : i64} {
  func.func @_decoder_head_kernel(%arg0: memref<8x32xf32, #tpu.memory_space<vmem>>, %arg1: memref<32x32xf32, #tpu.memory_space<vmem>>, %arg2: memref<1x32xf32, #tpu.memory_space<vmem>>, %arg3: memref<32x2xf32, #tpu.memory_space<vmem>>, %arg4: memref<1x2xf32, #tpu.memory_space<vmem>>, %arg5: memref<1x2xf32, #tpu.memory_space<vmem>>) attributes {dimension_semantics = [], scalar_prefetch = 0 : i64, scratch_operands = 0 : i64, tpu.core_type = #tpu.core_type<tc>} {
    %c0 = arith.constant 0 : index
    %c0_0 = arith.constant 0 : index
    %0 = vector.load %arg0[%c0, %c0_0] : memref<8x32xf32, #tpu.memory_space<vmem>>, vector<8x32xf32>
    %c0_1 = arith.constant 0 : index
    %c0_2 = arith.constant 0 : index
    %1 = vector.load %arg1[%c0_1, %c0_2] : memref<32x32xf32, #tpu.memory_space<vmem>>, vector<32x32xf32>
    %cst = arith.constant dense<0.000000e+00> : vector<8x32xf32>
    %2 = tpu.matmul %0, %1, %cst {dimension_numbers = #tpu.dot_dimension_numbers<[1], [0], [0], [1], [0, 0, 1, 1], [], []>} : vector<8x32xf32>, vector<32x32xf32>, vector<8x32xf32> -> vector<8x32xf32>
    %c0_3 = arith.constant 0 : index
    %c0_4 = arith.constant 0 : index
    %3 = vector.load %arg2[%c0_3, %c0_4] : memref<1x32xf32, #tpu.memory_space<vmem>>, vector<1x32xf32>
    %4 = vector.broadcast %3 : vector<1x32xf32> to vector<8x32xf32>
    %5 = arith.addf %2, %4 : vector<8x32xf32>
    %c0_5 = arith.constant 0 : index
    %c0_6 = arith.constant 0 : index
    %6 = vector.load %arg3[%c0_5, %c0_6] : memref<32x2xf32, #tpu.memory_space<vmem>>, vector<32x2xf32>
    %cst_7 = arith.constant dense<0.000000e+00> : vector<8x2xf32>
    %7 = tpu.matmul %5, %6, %cst_7 {dimension_numbers = #tpu.dot_dimension_numbers<[1], [0], [0], [1], [0, 0, 1, 1], [], []>} : vector<8x32xf32>, vector<32x2xf32>, vector<8x2xf32> -> vector<8x2xf32>
    %c0_8 = arith.constant 0 : index
    %c0_9 = arith.constant 0 : index
    %8 = vector.load %arg4[%c0_8, %c0_9] : memref<1x2xf32, #tpu.memory_space<vmem>>, vector<1x2xf32>
    %9 = vector.broadcast %8 : vector<1x2xf32> to vector<8x2xf32>
    %10 = arith.addf %7, %9 : vector<8x2xf32>
    %11 = vector.extract_strided_slice %10 {offsets = [0, 0], sizes = [1, 2], strides = [1, 1]} : vector<8x2xf32> to vector<1x2xf32>
    %c0_10 = arith.constant 0 : index
    %c0_11 = arith.constant 0 : index
    %12 = vector.load %arg5[%c0_10, %c0_11] : memref<1x2xf32, #tpu.memory_space<vmem>>, vector<1x2xf32>
    tpu.vector_store %arg5[%c0_10, %c0_11], %11 {strides = array<i32>} : memref<1x2xf32, #tpu.memory_space<vmem>>, vector<1x2xf32>,
    return
  }
}

module attributes {stable_mosaic.version = 11 : i64} {
  func.func @_transformer_encoder_kernel(%arg0: i32, %arg1: i32, %arg2: memref<1x8x32xf32, #tpu.memory_space<vmem>>, %arg3: memref<8x32xf32, #tpu.memory_space<vmem>>, %arg4: memref<8x8xf32, #tpu.memory_space<vmem>>, %arg5: memref<1x4x8x32xf32, #tpu.memory_space<vmem>>, %arg6: memref<1x4x1x8xf32, #tpu.memory_space<vmem>>, %arg7: memref<1x4x8x32xf32, #tpu.memory_space<vmem>>, %arg8: memref<1x4x1x8xf32, #tpu.memory_space<vmem>>, %arg9: memref<1x4x8x32xf32, #tpu.memory_space<vmem>>, %arg10: memref<1x4x1x8xf32, #tpu.memory_space<vmem>>, %arg11: memref<1x4x8x32xf32, #tpu.memory_space<vmem>>, %arg12: memref<1x1x32xf32, #tpu.memory_space<vmem>>, %arg13: memref<1x1x32xf32, #tpu.memory_space<vmem>>, %arg14: memref<1x1x32xf32, #tpu.memory_space<vmem>>, %arg15: memref<1x32x64xf32, #tpu.memory_space<vmem>>, %arg16: memref<1x1x64xf32, #tpu.memory_space<vmem>>, %arg17: memref<1x64x32xf32, #tpu.memory_space<vmem>>, %arg18: memref<1x1x32xf32, #tpu.memory_space<vmem>>, %arg19: memref<1x1x32xf32, #tpu.memory_space<vmem>>, %arg20: memref<1x1x32xf32, #tpu.memory_space<vmem>>, %arg21: memref<1x8x32xf32, #tpu.memory_space<vmem>>, %arg22: memref<8x32xf32, #tpu.memory_space<vmem>>) attributes {dimension_semantics = [#tpu.dimension_semantics<parallel>, #tpu.dimension_semantics<arbitrary>], iteration_bounds = array<i64: 2, 2>, scalar_prefetch = 0 : i64, scratch_operands = 1 : i64, tpu.core_type = #tpu.core_type<tc>, window_params = [{transform_indices = @transform_0, window_bounds = array<i64: 1, 8, 32>}, {pipeline_mode = #tpu.pipeline_mode<synchronous>, transform_indices = @transform_1, window_bounds = array<i64: 8, 32>}, {pipeline_mode = #tpu.pipeline_mode<synchronous>, transform_indices = @transform_2, window_bounds = array<i64: 8, 8>}, {transform_indices = @transform_3, window_bounds = array<i64: 1, 4, 8, 32>}, {transform_indices = @transform_4, window_bounds = array<i64: 1, 4, 1, 8>}, {transform_indices = @transform_5, window_bounds = array<i64: 1, 4, 8, 32>}, {transform_indices = @transform_6, window_bounds = array<i64: 1, 4, 1, 8>}, {transform_indices = @transform_7, window_bounds = array<i64: 1, 4, 8, 32>}, {transform_indices = @transform_8, window_bounds = array<i64: 1, 4, 1, 8>}, {transform_indices = @transform_9, window_bounds = array<i64: 1, 4, 8, 32>}, {transform_indices = @transform_10, window_bounds = array<i64: 1, 1, 32>}, {transform_indices = @transform_11, window_bounds = array<i64: 1, 1, 32>}, {transform_indices = @transform_12, window_bounds = array<i64: 1, 1, 32>}, {transform_indices = @transform_13, window_bounds = array<i64: 1, 32, 64>}, {transform_indices = @transform_14, window_bounds = array<i64: 1, 1, 64>}, {transform_indices = @transform_15, window_bounds = array<i64: 1, 64, 32>}, {transform_indices = @transform_16, window_bounds = array<i64: 1, 1, 32>}, {transform_indices = @transform_17, window_bounds = array<i64: 1, 1, 32>}, {transform_indices = @transform_18, window_bounds = array<i64: 1, 1, 32>}, {transform_indices = @transform_19, window_bounds = array<i64: 1, 8, 32>}]} {
    %c0_i32 = arith.constant 0 : i32
    %0 = arith.cmpi eq, %arg1, %c0_i32 : i32
    %1 = arith.extui %0 : i1 to i32
    %c0_i32_0 = arith.constant 0 : i32
    %2 = arith.cmpi ne, %1, %c0_i32_0 : i32
    scf.if %2 {
      %c0_84 = arith.constant 0 : index
      %c0_85 = arith.constant 0 : index
      %c0_86 = arith.constant 0 : index
      %127 = vector.load %arg2[%c0_84, %c0_85, %c0_86] : memref<1x8x32xf32, #tpu.memory_space<vmem>>, vector<1x8x32xf32>
      %128 = vector.shape_cast %127 : vector<1x8x32xf32> to vector<8x32xf32>
      %cst_87 = arith.constant 5.65685415 : f32
      %129 = vector.broadcast %cst_87 : f32 to vector<8x32xf32>
      %130 = arith.mulf %128, %129 : vector<8x32xf32>
      %c0_88 = arith.constant 0 : index
      %c0_89 = arith.constant 0 : index
      %131 = vector.load %arg3[%c0_88, %c0_89] : memref<8x32xf32, #tpu.memory_space<vmem>>, vector<8x32xf32>
      %132 = arith.addf %130, %131 : vector<8x32xf32>
      %c0_90 = arith.constant 0 : index
      %c0_91 = arith.constant 0 : index
      %133 = vector.load %arg22[%c0_90, %c0_91] : memref<8x32xf32, #tpu.memory_space<vmem>>, vector<8x32xf32>
      tpu.vector_store %arg22[%c0_90, %c0_91], %132 {strides = array<i32>} : memref<8x32xf32, #tpu.memory_space<vmem>>, vector<8x32xf32>,
    } else {
    }
    %c0 = arith.constant 0 : index
    %c0_1 = arith.constant 0 : index
    %3 = vector.load %arg22[%c0, %c0_1] : memref<8x32xf32, #tpu.memory_space<vmem>>, vector<8x32xf32>
    %4 = vector.shape_cast %3 : vector<8x32xf32> to vector<1x8x32xf32>
    %5 = vector.shape_cast %4 : vector<1x8x32xf32> to vector<1x8x32xf32>
    %6 = vector.broadcast %5 : vector<1x8x32xf32> to vector<4x8x32xf32>
    %c0_2 = arith.constant 0 : index
    %c0_3 = arith.constant 0 : index
    %c0_4 = arith.constant 0 : index
    %c0_5 = arith.constant 0 : index
    %7 = vector.load %arg5[%c0_2, %c0_3, %c0_4, %c0_5] : memref<1x4x8x32xf32, #tpu.memory_space<vmem>>, vector<1x4x8x32xf32>
    %8 = vector.shape_cast %7 : vector<1x4x8x32xf32> to vector<4x8x32xf32>
    "tpu.trace_start"() <{level = 10 : i32, message = "hse,hde->hsd"}> : () -> ()
    %cst = arith.constant dense<0.000000e+00> : vector<4x8x8xf32>
    %9 = tpu.matmul %6, %8, %cst {dimension_numbers = #tpu.dot_dimension_numbers<[2], [2], [1], [1], [0, 0, 0, 1, 1, 1], [0], [0]>} : vector<4x8x32xf32>, vector<4x8x32xf32>, vector<4x8x8xf32> -> vector<4x8x8xf32>
    "tpu.trace_stop"() : () -> ()
    %c0_6 = arith.constant 0 : index
    %c0_7 = arith.constant 0 : index
    %c0_8 = arith.constant 0 : index
    %c0_9 = arith.constant 0 : index
    %10 = vector.load %arg6[%c0_6, %c0_7, %c0_8, %c0_9] : memref<1x4x1x8xf32, #tpu.memory_space<vmem>>, vector<1x4x1x8xf32>
    %11 = vector.shape_cast %10 : vector<1x4x1x8xf32> to vector<4x1x8xf32>
    %12 = vector.broadcast %11 : vector<4x1x8xf32> to vector<4x8x8xf32>
    %13 = arith.addf %9, %12 : vector<4x8x8xf32>
    %cst_10 = arith.constant 0.353553385 : f32
    %14 = vector.broadcast %cst_10 : f32 to vector<4x8x8xf32>
    %15 = arith.mulf %13, %14 : vector<4x8x8xf32>
    %c0_11 = arith.constant 0 : index
    %c0_12 = arith.constant 0 : index
    %c0_13 = arith.constant 0 : index
    %c0_14 = arith.constant 0 : index
    %16 = vector.load %arg7[%c0_11, %c0_12, %c0_13, %c0_14] : memref<1x4x8x32xf32, #tpu.memory_space<vmem>>, vector<1x4x8x32xf32>
    %17 = vector.shape_cast %16 : vector<1x4x8x32xf32> to vector<4x8x32xf32>
    "tpu.trace_start"() <{level = 10 : i32, message = "hse,hde->hsd"}> : () -> ()
    %cst_15 = arith.constant dense<0.000000e+00> : vector<4x8x8xf32>
    %18 = tpu.matmul %6, %17, %cst_15 {dimension_numbers = #tpu.dot_dimension_numbers<[2], [2], [1], [1], [0, 0, 0, 1, 1, 1], [0], [0]>} : vector<4x8x32xf32>, vector<4x8x32xf32>, vector<4x8x8xf32> -> vector<4x8x8xf32>
    "tpu.trace_stop"() : () -> ()
    %c0_16 = arith.constant 0 : index
    %c0_17 = arith.constant 0 : index
    %c0_18 = arith.constant 0 : index
    %c0_19 = arith.constant 0 : index
    %19 = vector.load %arg8[%c0_16, %c0_17, %c0_18, %c0_19] : memref<1x4x1x8xf32, #tpu.memory_space<vmem>>, vector<1x4x1x8xf32>
    %20 = vector.shape_cast %19 : vector<1x4x1x8xf32> to vector<4x1x8xf32>
    %21 = vector.broadcast %20 : vector<4x1x8xf32> to vector<4x8x8xf32>
    %22 = arith.addf %18, %21 : vector<4x8x8xf32>
    %c0_20 = arith.constant 0 : index
    %c0_21 = arith.constant 0 : index
    %c0_22 = arith.constant 0 : index
    %c0_23 = arith.constant 0 : index
    %23 = vector.load %arg9[%c0_20, %c0_21, %c0_22, %c0_23] : memref<1x4x8x32xf32, #tpu.memory_space<vmem>>, vector<1x4x8x32xf32>
    %24 = vector.shape_cast %23 : vector<1x4x8x32xf32> to vector<4x8x32xf32>
    "tpu.trace_start"() <{level = 10 : i32, message = "hse,hde->hsd"}> : () -> ()
    %cst_24 = arith.constant dense<0.000000e+00> : vector<4x8x8xf32>
    %25 = tpu.matmul %6, %24, %cst_24 {dimension_numbers = #tpu.dot_dimension_numbers<[2], [2], [1], [1], [0, 0, 0, 1, 1, 1], [0], [0]>} : vector<4x8x32xf32>, vector<4x8x32xf32>, vector<4x8x8xf32> -> vector<4x8x8xf32>
    "tpu.trace_stop"() : () -> ()
    %c0_25 = arith.constant 0 : index
    %c0_26 = arith.constant 0 : index
    %c0_27 = arith.constant 0 : index
    %c0_28 = arith.constant 0 : index
    %26 = vector.load %arg10[%c0_25, %c0_26, %c0_27, %c0_28] : memref<1x4x1x8xf32, #tpu.memory_space<vmem>>, vector<1x4x1x8xf32>
    %27 = vector.shape_cast %26 : vector<1x4x1x8xf32> to vector<4x1x8xf32>
    %28 = vector.broadcast %27 : vector<4x1x8xf32> to vector<4x8x8xf32>
    %29 = arith.addf %25, %28 : vector<4x8x8xf32>
    "tpu.trace_start"() <{level = 10 : i32, message = "hqd,hkd->hqk"}> : () -> ()
    %cst_29 = arith.constant dense<0.000000e+00> : vector<4x8x8xf32>
    %30 = tpu.matmul %15, %22, %cst_29 {dimension_numbers = #tpu.dot_dimension_numbers<[2], [2], [1], [1], [0, 0, 0, 1, 1, 1], [0], [0]>} : vector<4x8x8xf32>, vector<4x8x8xf32>, vector<4x8x8xf32> -> vector<4x8x8xf32>
    "tpu.trace_stop"() : () -> ()
    %c0_30 = arith.constant 0 : index
    %c0_31 = arith.constant 0 : index
    %31 = vector.load %arg4[%c0_30, %c0_31] : memref<8x8xf32, #tpu.memory_space<vmem>>, vector<8x8xf32>
    %32 = vector.shape_cast %31 : vector<8x8xf32> to vector<1x8x8xf32>
    %33 = vector.broadcast %32 : vector<1x8x8xf32> to vector<4x8x8xf32>
    %34 = arith.addf %30, %33 : vector<4x8x8xf32>
    %cst_32 = arith.constant dense<0xFF800000> : vector<4x8xf32>
    %35 = vector.multi_reduction <maximumf>, %34, %cst_32 [2] : vector<4x8x8xf32> to vector<4x8xf32>
    %36 = vector.shape_cast %35 : vector<4x8xf32> to vector<4x8x1xf32>
    %37 = vector.broadcast %36 : vector<4x8x1xf32> to vector<4x8x8xf32>
    %38 = arith.subf %34, %37 : vector<4x8x8xf32>
    %39 = math.exp %38 : vector<4x8x8xf32>
    %cst_33 = arith.constant dense<0.000000e+00> : vector<4x8xf32>
    %40 = vector.multi_reduction <add>, %39, %cst_33 [2] : vector<4x8x8xf32> to vector<4x8xf32>
    %41 = vector.shape_cast %40 : vector<4x8xf32> to vector<4x8x1xf32>
    %42 = vector.broadcast %41 : vector<4x8x1xf32> to vector<4x8x8xf32>
    %43 = arith.divf %39, %42 : vector<4x8x8xf32>
    "tpu.trace_start"() <{level = 10 : i32, message = "hqk,hkd->hqd"}> : () -> ()
    %cst_34 = arith.constant dense<0.000000e+00> : vector<4x8x8xf32>
    %44 = tpu.matmul %43, %29, %cst_34 {dimension_numbers = #tpu.dot_dimension_numbers<[2], [1], [1], [2], [0, 0, 0, 1, 1, 2], [0], [0]>} : vector<4x8x8xf32>, vector<4x8x8xf32>, vector<4x8x8xf32> -> vector<4x8x8xf32>
    "tpu.trace_stop"() : () -> ()
    %c0_35 = arith.constant 0 : index
    %c0_36 = arith.constant 0 : index
    %c0_37 = arith.constant 0 : index
    %c0_38 = arith.constant 0 : index
    %45 = vector.load %arg11[%c0_35, %c0_36, %c0_37, %c0_38] : memref<1x4x8x32xf32, #tpu.memory_space<vmem>>, vector<1x4x8x32xf32>
    %46 = vector.shape_cast %45 : vector<1x4x8x32xf32> to vector<4x8x32xf32>
    "tpu.trace_start"() <{level = 10 : i32, message = "hsd,hde->hse"}> : () -> ()
    %cst_39 = arith.constant dense<0.000000e+00> : vector<4x8x32xf32>
    %47 = tpu.matmul %44, %46, %cst_39 {dimension_numbers = #tpu.dot_dimension_numbers<[2], [1], [1], [2], [0, 0, 0, 1, 1, 2], [0], [0]>} : vector<4x8x8xf32>, vector<4x8x32xf32>, vector<4x8x32xf32> -> vector<4x8x32xf32>
    "tpu.trace_stop"() : () -> ()
    %cst_40 = arith.constant dense<0.000000e+00> : vector<8x32xf32>
    %48 = vector.multi_reduction <add>, %47, %cst_40 [0] : vector<4x8x32xf32> to vector<8x32xf32>
    %c0_41 = arith.constant 0 : index
    %c0_42 = arith.constant 0 : index
    %c0_43 = arith.constant 0 : index
    %49 = vector.load %arg12[%c0_41, %c0_42, %c0_43] : memref<1x1x32xf32, #tpu.memory_space<vmem>>, vector<1x1x32xf32>
    %50 = vector.shape_cast %49 : vector<1x1x32xf32> to vector<1x32xf32>
    %51 = vector.broadcast %50 : vector<1x32xf32> to vector<8x32xf32>
    %52 = arith.addf %48, %51 : vector<8x32xf32>
    %53 = arith.addf %3, %52 : vector<8x32xf32>
    %c0_44 = arith.constant 0 : index
    %c0_45 = arith.constant 0 : index
    %c0_46 = arith.constant 0 : index
    %54 = vector.load %arg13[%c0_44, %c0_45, %c0_46] : memref<1x1x32xf32, #tpu.memory_space<vmem>>, vector<1x1x32xf32>
    %55 = vector.shape_cast %54 : vector<1x1x32xf32> to vector<1x32xf32>
    %c0_47 = arith.constant 0 : index
    %c0_48 = arith.constant 0 : index
    %c0_49 = arith.constant 0 : index
    %56 = vector.load %arg14[%c0_47, %c0_48, %c0_49] : memref<1x1x32xf32, #tpu.memory_space<vmem>>, vector<1x1x32xf32>
    %57 = vector.shape_cast %56 : vector<1x1x32xf32> to vector<1x32xf32>
    %cst_50 = arith.constant dense<0.000000e+00> : vector<8xf32>
    %58 = vector.multi_reduction <add>, %53, %cst_50 [1] : vector<8x32xf32> to vector<8xf32>
    %59 = vector.shape_cast %58 : vector<8xf32> to vector<8x1xf32>
    %cst_51 = arith.constant 3.200000e+01 : f32
    %60 = vector.broadcast %cst_51 : f32 to vector<8x1xf32>
    %61 = arith.divf %59, %60 : vector<8x1xf32>
    %62 = vector.broadcast %61 : vector<8x1xf32> to vector<8x32xf32>
    %63 = arith.subf %53, %62 : vector<8x32xf32>
    %64 = arith.mulf %63, %63 : vector<8x32xf32>
    %cst_52 = arith.constant dense<0.000000e+00> : vector<8xf32>
    %65 = vector.multi_reduction <add>, %64, %cst_52 [1] : vector<8x32xf32> to vector<8xf32>
    %66 = vector.shape_cast %65 : vector<8xf32> to vector<8x1xf32>
    %cst_53 = arith.constant 3.200000e+01 : f32
    %67 = vector.broadcast %cst_53 : f32 to vector<8x1xf32>
    %68 = arith.divf %66, %67 : vector<8x1xf32>
    %69 = vector.broadcast %61 : vector<8x1xf32> to vector<8x32xf32>
    %70 = arith.subf %53, %69 : vector<8x32xf32>
    %cst_54 = arith.constant 9.99999974E-6 : f32
    %71 = vector.broadcast %cst_54 : f32 to vector<8x1xf32>
    %72 = arith.addf %68, %71 : vector<8x1xf32>
    %73 = math.rsqrt %72 : vector<8x1xf32>
    %74 = vector.broadcast %73 : vector<8x1xf32> to vector<8x32xf32>
    %75 = arith.mulf %70, %74 : vector<8x32xf32>
    %76 = vector.broadcast %55 : vector<1x32xf32> to vector<8x32xf32>
    %77 = arith.mulf %75, %76 : vector<8x32xf32>
    %78 = vector.broadcast %57 : vector<1x32xf32> to vector<8x32xf32>
    %79 = arith.addf %77, %78 : vector<8x32xf32>
    %c0_55 = arith.constant 0 : index
    %c0_56 = arith.constant 0 : index
    %c0_57 = arith.constant 0 : index
    %80 = vector.load %arg15[%c0_55, %c0_56, %c0_57] : memref<1x32x64xf32, #tpu.memory_space<vmem>>, vector<1x32x64xf32>
    %81 = vector.shape_cast %80 : vector<1x32x64xf32> to vector<32x64xf32>
    %cst_58 = arith.constant dense<0.000000e+00> : vector<8x64xf32>
    %82 = tpu.matmul %79, %81, %cst_58 {dimension_numbers = #tpu.dot_dimension_numbers<[1], [0], [0], [1], [0, 0, 1, 1], [], []>} : vector<8x32xf32>, vector<32x64xf32>, vector<8x64xf32> -> vector<8x64xf32>
    %c0_59 = arith.constant 0 : index
    %c0_60 = arith.constant 0 : index
    %c0_61 = arith.constant 0 : index
    %83 = vector.load %arg16[%c0_59, %c0_60, %c0_61] : memref<1x1x64xf32, #tpu.memory_space<vmem>>, vector<1x1x64xf32>
    %84 = vector.shape_cast %83 : vector<1x1x64xf32> to vector<1x64xf32>
    %85 = vector.broadcast %84 : vector<1x64xf32> to vector<8x64xf32>
    %86 = arith.addf %82, %85 : vector<8x64xf32>
    %cst_62 = arith.constant 0.000000e+00 : f32
    %87 = vector.broadcast %cst_62 : f32 to vector<8x64xf32>
    %88 = arith.maximumf %86, %87 : vector<8x64xf32>
    %c0_63 = arith.constant 0 : index
    %c0_64 = arith.constant 0 : index
    %c0_65 = arith.constant 0 : index
    %89 = vector.load %arg17[%c0_63, %c0_64, %c0_65] : memref<1x64x32xf32, #tpu.memory_space<vmem>>, vector<1x64x32xf32>
    %90 = vector.shape_cast %89 : vector<1x64x32xf32> to vector<64x32xf32>
    %cst_66 = arith.constant dense<0.000000e+00> : vector<8x32xf32>
    %91 = tpu.matmul %88, %90, %cst_66 {dimension_numbers = #tpu.dot_dimension_numbers<[1], [0], [0], [1], [0, 0, 1, 1], [], []>} : vector<8x64xf32>, vector<64x32xf32>, vector<8x32xf32> -> vector<8x32xf32>
    %c0_67 = arith.constant 0 : index
    %c0_68 = arith.constant 0 : index
    %c0_69 = arith.constant 0 : index
    %92 = vector.load %arg18[%c0_67, %c0_68, %c0_69] : memref<1x1x32xf32, #tpu.memory_space<vmem>>, vector<1x1x32xf32>
    %93 = vector.shape_cast %92 : vector<1x1x32xf32> to vector<1x32xf32>
    %94 = vector.broadcast %93 : vector<1x32xf32> to vector<8x32xf32>
    %95 = arith.addf %91, %94 : vector<8x32xf32>
    %96 = arith.addf %79, %95 : vector<8x32xf32>
    %c0_70 = arith.constant 0 : index
    %c0_71 = arith.constant 0 : index
    %c0_72 = arith.constant 0 : index
    %97 = vector.load %arg19[%c0_70, %c0_71, %c0_72] : memref<1x1x32xf32, #tpu.memory_space<vmem>>, vector<1x1x32xf32>
    %98 = vector.shape_cast %97 : vector<1x1x32xf32> to vector<1x32xf32>
    %c0_73 = arith.constant 0 : index
    %c0_74 = arith.constant 0 : index
    %c0_75 = arith.constant 0 : index
    %99 = vector.load %arg20[%c0_73, %c0_74, %c0_75] : memref<1x1x32xf32, #tpu.memory_space<vmem>>, vector<1x1x32xf32>
    %100 = vector.shape_cast %99 : vector<1x1x32xf32> to vector<1x32xf32>
    %cst_76 = arith.constant dense<0.000000e+00> : vector<8xf32>
    %101 = vector.multi_reduction <add>, %96, %cst_76 [1] : vector<8x32xf32> to vector<8xf32>
    %102 = vector.shape_cast %101 : vector<8xf32> to vector<8x1xf32>
    %cst_77 = arith.constant 3.200000e+01 : f32
    %103 = vector.broadcast %cst_77 : f32 to vector<8x1xf32>
    %104 = arith.divf %102, %103 : vector<8x1xf32>
    %105 = vector.broadcast %104 : vector<8x1xf32> to vector<8x32xf32>
    %106 = arith.subf %96, %105 : vector<8x32xf32>
    %107 = arith.mulf %106, %106 : vector<8x32xf32>
    %cst_78 = arith.constant dense<0.000000e+00> : vector<8xf32>
    %108 = vector.multi_reduction <add>, %107, %cst_78 [1] : vector<8x32xf32> to vector<8xf32>
    %109 = vector.shape_cast %108 : vector<8xf32> to vector<8x1xf32>
    %cst_79 = arith.constant 3.200000e+01 : f32
    %110 = vector.broadcast %cst_79 : f32 to vector<8x1xf32>
    %111 = arith.divf %109, %110 : vector<8x1xf32>
    %112 = vector.broadcast %104 : vector<8x1xf32> to vector<8x32xf32>
    %113 = arith.subf %96, %112 : vector<8x32xf32>
    %cst_80 = arith.constant 9.99999974E-6 : f32
    %114 = vector.broadcast %cst_80 : f32 to vector<8x1xf32>
    %115 = arith.addf %111, %114 : vector<8x1xf32>
    %116 = math.rsqrt %115 : vector<8x1xf32>
    %117 = vector.broadcast %116 : vector<8x1xf32> to vector<8x32xf32>
    %118 = arith.mulf %113, %117 : vector<8x32xf32>
    %119 = vector.broadcast %98 : vector<1x32xf32> to vector<8x32xf32>
    %120 = arith.mulf %118, %119 : vector<8x32xf32>
    %121 = vector.broadcast %100 : vector<1x32xf32> to vector<8x32xf32>
    %122 = arith.addf %120, %121 : vector<8x32xf32>
    %c0_81 = arith.constant 0 : index
    %c0_82 = arith.constant 0 : index
    %123 = vector.load %arg22[%c0_81, %c0_82] : memref<8x32xf32, #tpu.memory_space<vmem>>, vector<8x32xf32>
    tpu.vector_store %arg22[%c0_81, %c0_82], %122 {strides = array<i32>} : memref<8x32xf32, #tpu.memory_space<vmem>>, vector<8x32xf32>,
    %c1_i32 = arith.constant 1 : i32
    %124 = arith.cmpi eq, %arg1, %c1_i32 : i32
    %125 = arith.extui %124 : i1 to i32
    %c0_i32_83 = arith.constant 0 : i32
    %126 = arith.cmpi ne, %125, %c0_i32_83 : i32
    scf.if %126 {
      %c0_84 = arith.constant 0 : index
      %c0_85 = arith.constant 0 : index
      %c0_86 = arith.constant 0 : index
      %127 = vector.load %arg21[%c0_84, %c0_85, %c0_86] : memref<1x8x32xf32, #tpu.memory_space<vmem>>, vector<1x8x32xf32>
      %128 = vector.shape_cast %127 : vector<1x8x32xf32> to vector<8x32xf32>
      %129 = vector.shape_cast %122 : vector<8x32xf32> to vector<1x8x32xf32>
      tpu.vector_store %arg21[%c0_84, %c0_85, %c0_86], %129 {strides = array<i32>} : memref<1x8x32xf32, #tpu.memory_space<vmem>>, vector<1x8x32xf32>,
    } else {
    }
    return
  }
  func.func @transform_0(%arg0: i32, %arg1: i32) -> (i32, i32, i32) {
    %c0_i32 = arith.constant 0 : i32
    %c0_i32_0 = arith.constant 0 : i32
    %c0_i32_1 = arith.constant 0 : i32
    return %arg0, %c0_i32, %c0_i32_0 : i32, i32, i32
  }
  func.func @transform_1(%arg0: i32, %arg1: i32) -> (i32, i32) {
    %c0_i32 = arith.constant 0 : i32
    %c0_i32_0 = arith.constant 0 : i32
    %c0_i32_1 = arith.constant 0 : i32
    return %c0_i32, %c0_i32_0 : i32, i32
  }
  func.func @transform_2(%arg0: i32, %arg1: i32) -> (i32, i32) {
    %c0_i32 = arith.constant 0 : i32
    %c0_i32_0 = arith.constant 0 : i32
    %c0_i32_1 = arith.constant 0 : i32
    return %c0_i32, %c0_i32_0 : i32, i32
  }
  func.func @transform_3(%arg0: i32, %arg1: i32) -> (i32, i32, i32, i32) {
    %c0_i32 = arith.constant 0 : i32
    %c0_i32_0 = arith.constant 0 : i32
    %c0_i32_1 = arith.constant 0 : i32
    %c0_i32_2 = arith.constant 0 : i32
    return %arg1, %c0_i32, %c0_i32_0, %c0_i32_1 : i32, i32, i32, i32
  }
  func.func @transform_4(%arg0: i32, %arg1: i32) -> (i32, i32, i32, i32) {
    %c0_i32 = arith.constant 0 : i32
    %c0_i32_0 = arith.constant 0 : i32
    %c0_i32_1 = arith.constant 0 : i32
    %c0_i32_2 = arith.constant 0 : i32
    return %arg1, %c0_i32, %c0_i32_0, %c0_i32_1 : i32, i32, i32, i32
  }
  func.func @transform_5(%arg0: i32, %arg1: i32) -> (i32, i32, i32, i32) {
    %c0_i32 = arith.constant 0 : i32
    %c0_i32_0 = arith.constant 0 : i32
    %c0_i32_1 = arith.constant 0 : i32
    %c0_i32_2 = arith.constant 0 : i32
    return %arg1, %c0_i32, %c0_i32_0, %c0_i32_1 : i32, i32, i32, i32
  }
  func.func @transform_6(%arg0: i32, %arg1: i32) -> (i32, i32, i32, i32) {
    %c0_i32 = arith.constant 0 : i32
    %c0_i32_0 = arith.constant 0 : i32
    %c0_i32_1 = arith.constant 0 : i32
    %c0_i32_2 = arith.constant 0 : i32
    return %arg1, %c0_i32, %c0_i32_0, %c0_i32_1 : i32, i32, i32, i32
  }
  func.func @transform_7(%arg0: i32, %arg1: i32) -> (i32, i32, i32, i32) {
    %c0_i32 = arith.constant 0 : i32
    %c0_i32_0 = arith.constant 0 : i32
    %c0_i32_1 = arith.constant 0 : i32
    %c0_i32_2 = arith.constant 0 : i32
    return %arg1, %c0_i32, %c0_i32_0, %c0_i32_1 : i32, i32, i32, i32
  }
  func.func @transform_8(%arg0: i32, %arg1: i32) -> (i32, i32, i32, i32) {
    %c0_i32 = arith.constant 0 : i32
    %c0_i32_0 = arith.constant 0 : i32
    %c0_i32_1 = arith.constant 0 : i32
    %c0_i32_2 = arith.constant 0 : i32
    return %arg1, %c0_i32, %c0_i32_0, %c0_i32_1 : i32, i32, i32, i32
  }
  func.func @transform_9(%arg0: i32, %arg1: i32) -> (i32, i32, i32, i32) {
    %c0_i32 = arith.constant 0 : i32
    %c0_i32_0 = arith.constant 0 : i32
    %c0_i32_1 = arith.constant 0 : i32
    %c0_i32_2 = arith.constant 0 : i32
    return %arg1, %c0_i32, %c0_i32_0, %c0_i32_1 : i32, i32, i32, i32
  }
  func.func @transform_10(%arg0: i32, %arg1: i32) -> (i32, i32, i32) {
    %c0_i32 = arith.constant 0 : i32
    %c0_i32_0 = arith.constant 0 : i32
    %c0_i32_1 = arith.constant 0 : i32
    return %arg1, %c0_i32, %c0_i32_0 : i32, i32, i32
  }
  func.func @transform_11(%arg0: i32, %arg1: i32) -> (i32, i32, i32) {
    %c0_i32 = arith.constant 0 : i32
    %c0_i32_0 = arith.constant 0 : i32
    %c0_i32_1 = arith.constant 0 : i32
    return %arg1, %c0_i32, %c0_i32_0 : i32, i32, i32
  }
  func.func @transform_12(%arg0: i32, %arg1: i32) -> (i32, i32, i32) {
    %c0_i32 = arith.constant 0 : i32
    %c0_i32_0 = arith.constant 0 : i32
    %c0_i32_1 = arith.constant 0 : i32
    return %arg1, %c0_i32, %c0_i32_0 : i32, i32, i32
  }
  func.func @transform_13(%arg0: i32, %arg1: i32) -> (i32, i32, i32) {
    %c0_i32 = arith.constant 0 : i32
    %c0_i32_0 = arith.constant 0 : i32
    %c0_i32_1 = arith.constant 0 : i32
    return %arg1, %c0_i32, %c0_i32_0 : i32, i32, i32
  }
  func.func @transform_14(%arg0: i32, %arg1: i32) -> (i32, i32, i32) {
    %c0_i32 = arith.constant 0 : i32
    %c0_i32_0 = arith.constant 0 : i32
    %c0_i32_1 = arith.constant 0 : i32
    return %arg1, %c0_i32, %c0_i32_0 : i32, i32, i32
  }
  func.func @transform_15(%arg0: i32, %arg1: i32) -> (i32, i32, i32) {
    %c0_i32 = arith.constant 0 : i32
    %c0_i32_0 = arith.constant 0 : i32
    %c0_i32_1 = arith.constant 0 : i32
    return %arg1, %c0_i32, %c0_i32_0 : i32, i32, i32
  }
  func.func @transform_16(%arg0: i32, %arg1: i32) -> (i32, i32, i32) {
    %c0_i32 = arith.constant 0 : i32
    %c0_i32_0 = arith.constant 0 : i32
    %c0_i32_1 = arith.constant 0 : i32
    return %arg1, %c0_i32, %c0_i32_0 : i32, i32, i32
  }
  func.func @transform_17(%arg0: i32, %arg1: i32) -> (i32, i32, i32) {
    %c0_i32 = arith.constant 0 : i32
    %c0_i32_0 = arith.constant 0 : i32
    %c0_i32_1 = arith.constant 0 : i32
    return %arg1, %c0_i32, %c0_i32_0 : i32, i32, i32
  }
  func.func @transform_18(%arg0: i32, %arg1: i32) -> (i32, i32, i32) {
    %c0_i32 = arith.constant 0 : i32
    %c0_i32_0 = arith.constant 0 : i32
    %c0_i32_1 = arith.constant 0 : i32
    return %arg1, %c0_i32, %c0_i32_0 : i32, i32, i32
  }
  func.func @transform_19(%arg0: i32, %arg1: i32) -> (i32, i32, i32) {
    %c0_i32 = arith.constant 0 : i32
    %c0_i32_0 = arith.constant 0 : i32
    %c0_i32_1 = arith.constant 0 : i32
    return %arg0, %c0_i32, %c0_i32_0 : i32, i32, i32
  }
}

</mosaic_0001>

<bundles_post_ra>
// kernel: training_block_forward.3
= control target key start
LH: loop header
LB: loop body
LE: loop exit
PB: predicated region body
PF: predicated region fallthrough
CT: control target
= control target key end

     0   :  { %v283_v3 = vmov 0.0|0.0   ;;  %vm284_vm0 = vmmov 0   ;;  %v285_v6 = vmov 0.0   ;;  %s362_s0 = inlined_call_operand.vmem [shape: f32[8,32], index: 0, kind: input, shape index: {}]   ;;  %s363_s1 = inlined_call_operand.vmem [shape: f32[32,32], index: 1, kind: input, shape index: {}]   ;;  %s364_s2 = inlined_call_operand.vmem [shape: f32[1,32], index: 2, kind: input, shape index: {}]   ;;  %s365_s3 = inlined_call_operand.vmem [shape: f32[32,2], index: 3, kind: input, shape index: {}]   ;;  %s366_s4 = inlined_call_operand.vmem [shape: f32[1,2], index: 4, kind: input, shape index: {}]   ;;  %s367_s5 = inlined_call_operand.hbm [shape: f32[1,2], index: 5, kind: output, shape index: {}]  }
   0x1   :  { %v22_v0 = vld [vmem:[%s363_s1] sm:$0xff]  ;;  %v23_v1 = vld [vmem:[%s363_s1 + $0x8] sm:$0xff]  ;;  %v24_v2 = vld [vmem:[%s363_s1 + $0x10] sm:$0xff]  ;;  %243 = vmatprep.subr.bf16.mxu0 %v283_v3  ;;  %229 = vmatprep.mubr.msk.f32.mxu0 %vm284_vm0, %v285_v6 }
   0x2   :  { %v244_v4 = vpack.c.bf16 %v23_v1, %v22_v0  ;;  %v25_v5 = vld [vmem:[%s363_s1 + $0x18] sm:$0xff]  ;;  %v107_v7 = vld [vmem:[%s365_s3] sm:$0xff]  ;;  %249 = vmatprep.subr.bf16.mxu1 %v283_v3  ;;  %v108_v8 = vld [vmem:[%s365_s3 + $0x8] sm:$0xff]  ;;  %240 = vmatprep.mubr.msk.f32.mxu1 %vm284_vm0, %v285_v6 }
   0x3   :  { %10 = vsyncpa [#allocation3], 0  ;;  %v247_v9 = vpack.c.bf16 %v25_v5, %v24_v2  ;;  %v250_v10 = vpack.c.bf16 %v108_v8, %v107_v7  ;;  %v21_v11 = vld [vmem:[%s362_s0] sm:$0xff]  ;;  %vm33_vm1 = vcmask 261120   ;;  %v109_v12 = vld [vmem:[%s365_s3 + $0x10] sm:$0xff]  ;;  %s286_s13 = smov [#allocation2]  }
   0x4   :  { %245 = vmatpush3.bf16.msra.mxu0 %v244_v4  ;;  %v110_v13 = vld [vmem:[%s365_s3 + $0x18] sm:$0xff]  ;;  %v207_v15 = vld [vmem:[%s364_s2] ss:$0 sm:$0xff]  ;;  %s199_s14 = sshll.u32 %s286_s13, 4  ;;  %vm191_vm2 = vcmask 8192   ;;  %s200_s14 = int_to_ptr.vmem [resolvable:$true] %s199_s14 }
   0x5   :  { %246 = vmatprep.subr.bf16.mxu0 %v283_v3  ;;  %251 = vmatpush3.bf16.msra.mxu1 %v250_v10  ;;  %v253_v14 = vpack.c.bf16 %v110_v13, %v109_v12  ;;  %v209_v19 = vld [vmem:[%s366_s4] ss:$0 sm:$0xff]  ;;  %s259_s3 = scalar_lea.vmem %s200_s14, 16  ;;  %s263_s15 = scalar_lea.vmem %s200_s14, 32 }
   0x6   :  { %252 = vmatprep.subr.bf16.mxu1 %v283_v3  ;;  %p260_p0 = scmp.ne.s32.totalorder %s200_s14, %s259_s3  ;;  %p264_p1 = scmp.lt.s32.totalorder %s200_s14, %s200_s14 }
   0x7   :  { %p265_p2 = scmp.lt.s32.totalorder %s263_s15, %s259_s3 }
   0x8   :  { %248 = vmatpush3.bf16.msra.mxu0 %v247_v9 }
   0x9   :  { %254 = vmatpush3.bf16.msra.mxu1 %v253_v14  ;;  %p266_p3 = por %p265_p2, %p264_p1 }
   0xb   :  { %230 = vmatmul.mubr.msk.f32.vlgmr.msra.gmra.mrb[0].mxu0 %vm33_vm1, %v21_v11  ;;  %p267_p4 = pnand %p266_p3, %p260_p0 }
  0xde   :  { %v103_v16 = vpop.f32.mrb[0].mxu0 }
  0xdf   :  { %v104_v17 = vadd.f32 %v207_v15, %v103_v16  ;;  %v231_v18 = vpop.f32.mrb[1].mxu0 }
  0xe1   :  { %241 = vmatmul.mubr.msk.f32.vlgmr.msra.gmra.mrb[0].mxu1 %vm33_vm1, %v104_v17 }
 0x1b4   :  { %v187_v20 = vpop.f32.mrb[0].mxu1 }
 0x1b5   :  { %v188_v21 = vadd.f32 %v209_v19, %v187_v20  ;;  %v242_v22 = vpop.f32.mrb[1].mxu1 }
 0x1b7   :  { %192 = vst.msk [vmem:[#allocation2] sm:$0x1] %vm191_vm2, %v188_v21 }
 0x1b8   :  { %270 = shalt.err (!%p267_p4)
}
 0x1b9   :  { %s271_s4 = scalar_lea.hbm %s367_s5, 16 }
 0x1ba   :  { %p272_p5 = scmp.ne.s32.totalorder %s367_s5, %s271_s4  ;;  %p275_p6 = scmp.lt.u32.totalorder %s271_s4, %s367_s5 }
 0x1bc   :  { %p277_p7 = pnand %p275_p6, %p272_p5 }
 0x1be   :  { %280 = shalt.err (!%p277_p7)
}
 0x1bf   :  { %202 = dma.vmem_to_hbm [thread:$0]  %s200_s14, 16, %s367_s5, [#allocation3]  }
 0x1c0   :  { %281 = dma.done.wait [#allocation3], 16  }
 0x1c1   :  { %282 = vsyncadd [#allocation3], 4294967280 }
 0x1c2   :  { %206 = vsyncpa [#allocation3], 1 }

// kernel: training_block_forward.2
= control target key start
LH: loop header
LB: loop body
LE: loop exit
PB: predicated region body
PF: predicated region fallthrough
CT: control target
= control target key end

     0   :  { %s3830_s30 = smov 0   ;;  %s3832_s20 = smov 0   ;;  %s4203_s0 = inlined_call_operand.vmem [shape: f32[2,8,32], index: 0, kind: input, shape index: {}]   ;;  %s4204_s1 = inlined_call_operand.vmem [shape: f32[8,32], index: 1, kind: input, shape index: {}]   ;;  %s4205_s2 = inlined_call_operand.vmem [shape: f32[8,8], index: 2, kind: input, shape index: {}]   ;;  %s4206_s3 = inlined_call_operand.vmem [shape: f32[2,4,8,32], index: 3, kind: input, shape index: {}]   ;;  %s4207_s4 = inlined_call_operand.vmem [shape: f32[2,4,1,8], index: 4, kind: input, shape index: {}]   ;;  %s4208_s5 = inlined_call_operand.vmem [shape: f32[2,4,8,32], index: 5, kind: input, shape index: {}]   ;;  %s4209_s6 = inlined_call_operand.vmem [shape: f32[2,4,1,8], index: 6, kind: input, shape index: {}]   ;;  %s4210_s7 = inlined_call_operand.vmem [shape: f32[2,4,8,32], index: 7, kind: input, shape index: {}]   ;;  %s4211_s8 = inlined_call_operand.vmem [shape: f32[2,4,1,8], index: 8, kind: input, shape index: {}]   ;;  %s4212_s9 = inlined_call_operand.vmem [shape: f32[2,4,8,32], index: 9, kind: input, shape index: {}]   ;;  %s4213_s10 = inlined_call_operand.vmem [shape: f32[2,1,32], index: 10, kind: input, shape index: {}]   ;;  %s4214_s11 = inlined_call_operand.vmem [shape: f32[2,1,32], index: 11, kind: input, shape index: {}]   ;;  %s4215_s12 = inlined_call_operand.vmem [shape: f32[2,1,32], index: 12, kind: input, shape index: {}]   ;;  %s4216_s13 = inlined_call_operand.vmem [shape: f32[2,32,64], index: 13, kind: input, shape index: {}]   ;;  %s4217_s14 = inlined_call_operand.vmem [shape: f32[2,1,64], index: 14, kind: input, shape index: {}]   ;;  %s4218_s15 = inlined_call_operand.vmem [shape: f32[2,64,32], index: 15, kind: input, shape index: {}]   ;;  %s4219_s16 = inlined_call_operand.vmem [shape: f32[2,1,32], index: 16, kind: input, shape index: {}]   ;;  %s4220_s17 = inlined_call_operand.vmem [shape: f32[2,1,32], index: 17, kind: input, shape index: {}]   ;;  %s4221_s18 = inlined_call_operand.vmem [shape: f32[2,1,32], index: 18, kind: input, shape index: {}]   ;;  %s4222_s19 = inlined_call_operand.vmem [shape: f32[2,8,32], index: 19, kind: output, shape index: {}]  }
   0x1   :  { %4230 = sst [smem:[#allocation12_spill]] %s4203_s0  ;;  %s3828_s0 = smov 0  }
   0x2   :  { %4231 = sst [smem:[#allocation13_spill]] %s4204_s1  ;;  %s3834_s21 = smov 0  }
   0x3   :  { %4232 = sst [smem:[#allocation14_spill]] %s4205_s2  ;;  %s3836_s1 = smov 0  }
   0x4   :  { %4233 = sst [smem:[#allocation15_spill]] %s4206_s3 }
   0x5   :  { %4234 = sst [smem:[#allocation16_spill]] %s4207_s4 }
   0x6   :  { %4235 = sst [smem:[#allocation17_spill]] %s4208_s5 }
   0x7   :  { %4236 = sst [smem:[#allocation18_spill]] %s4209_s6 }
   0x8   :  { %4237 = sst [smem:[#allocation19_spill]] %s4210_s7 }
   0x9   :  { %4238 = sst [smem:[#allocation20_spill]] %s4211_s8 }
   0xa   :  { %4239 = sst [smem:[#allocation21_spill]] %s4212_s9 }
   0xb   :  { %4240 = sst [smem:[#allocation22_spill]] %s4215_s12 }
   0xc   :  { %4241 = sst [smem:[#allocation23_spill]] %s4216_s13 }
   0xd   :  { %4242 = sst [smem:[#allocation24_spill]] %s4217_s14 }
   0xe   :  { %4243 = sst [smem:[#allocation25_spill]] %s4220_s17 }
   0xf   :  { %4244 = sst [smem:[#allocation26_spill]] %s4221_s18 }
  0x10   :  { %4245 = sst [smem:[#allocation27_spill]] %s4222_s19 }
  0x11 LB: > { %4246 = sst [smem:[#allocation3_spill]] %s3707_s0  ;;  %s38_s22 = sadd.s32 1, %s3715_s20  ;;  %s3723_s1 = sphi %s3836_s1, %s29_s1   ;;  %s3719_s21 = sphi %s3834_s21, %s4288_s21   ;;  %s3715_s20 = sphi %s3832_s20, %s4287_s20   ;;  %s3711_s30 = sphi %s3830_s30, %s4286_s30   ;;  %s3707_s0 = sphi %s3828_s0, %s4285_s0  }
  0x12   : > { %4247 = sst [smem:[#allocation4_spill]] %s3715_s20  ;;  %s41_s2 = sadd.s32 1, %s3719_s21 }
  0x13   : > { %4248 = sst [smem:[#allocation5_spill]] %s3719_s21  ;;  %p39_p0 = scmp.ge.s32.totalorder %s38_s22, 2 }
  0x14   : > { %4249 = sst [smem:[#allocation6_spill]] %s3723_s1  ;;  %p3303_p1 = scmp.ge.s32.totalorder %s3723_s1, 1 }
  0x15   : > { %p691_p2 = scmp.lt.s32.totalorder %s3723_s1, 5  ;;  %s4290_s22 = smov (%p39_p0, %s38_s22), 0 }
  0x16   : > { %4250 = sst [smem:[#allocation7_spill]] %s4290_s22  ;;  %s4292_s2 = smov (!%p39_p0, %s41_s2), %s3719_s21 }
  0x17   : > { %p692_p3 = pnand %p3303_p1, %p691_p2  ;;  %p43_p4 = scmp.ge.s32.totalorder %s4292_s2, 2 }
  0x19   : > { %s4294_s2 = smov (%p43_p4, %s4292_s2), 0  ;;  %695 = sbr.rel (%p692_p3) target bundleno = 2328 (0x918), region = 96 }
  0x1a   : > { %4251 = sst [smem:[#allocation8_spill]] %s4294_s2 }
  0x20   : > { %p808_p5 = scmp.lt.s32.totalorder %s3711_s30, 1  ;;  %p812_p6 = scmp.lt.s32.totalorder %s3707_s0, 1 }
  0x21   : > { %s4252_s26 = sld [smem:[#allocation12_spill]]  ;;  %s4253_s22 = sld [smem:[#allocation15_spill]] }
  0x22   : > { %s4296_s30 = smov (!%p808_p5, %s3711_s30), 1  ;;  %s4255_s4 = sld [smem:[#allocation16_spill]] }
  0x23   : > { %s3862_s23 = scalar_select %p812_p6, %s3707_s0, 1 }
  0x24   : > { %s3304_s24 = sshll.u32 %s4296_s30, 3  ;;  %s4257_s5 = sld [smem:[#allocation17_spill]] }
  0x25   : > { %s3386_s28 = sshll.u32 %s3862_s23, 5  ;;  %s3307_s20 = sshll.u32 %s3862_s23, 2 }
  0x26   : > { %s4258_s6 = sld [smem:[#allocation18_spill]]  ;;  %s4260_s7 = sld [smem:[#allocation19_spill]] }
  0x27   : > { %s811_s27 = scalar_lea.vmem %s4252_s26, %s3304_s24  ;;  %s3871_s21 = scalar_lea.vmem %s4253_s22, %s3386_s28 }
  0x28   : > { %4254 = sst [smem:[#allocation9_spill]] %s3871_s21  ;;  %s3877_s19 = scalar_lea.vmem %s4255_s4, %s3307_s20 }
  0x29   : > { %4256 = sst [smem:[#allocation10_spill]] %s3877_s19  ;;  %s4261_s8 = sld [smem:[#allocation20_spill]] }
  0x2a   : > { %s3882_s25 = scalar_lea.vmem %s4257_s5, %s3386_s28  ;;  %s4262_s9 = sld [smem:[#allocation21_spill]] }
  0x2b   : > { %s4264_s13 = sld [smem:[#allocation23_spill]]  ;;  %s4266_s22 = sld [smem:[#allocation25_spill]] }
  0x2c   : > { %s3887_s2 = scalar_lea.vmem %s4258_s6, %s3307_s20  ;;  %s3892_s21 = scalar_lea.vmem %s4260_s7, %s3386_s28 }
  0x2d   : > { %4259 = sst [smem:[#allocation11_spill]] %s3887_s2  ;;  %s868_s7 = scalar_lea.vmem %s4219_s16, %s3862_s23 }
  0x2e   : > { %s4269_s5 = sld [smem:[#allocation3_spill]] }
  0x2f   : > { %s3897_s1 = scalar_lea.vmem %s4261_s8, %s3307_s20  ;;  %s4268_s8 = sld [smem:[#allocation27_spill]] }
  0x30   : > { %s3902_s18 = scalar_lea.vmem %s4262_s9, %s3386_s28  ;;  %s3391_s9 = sshll.u32 %s3862_s23, 6 }
  0x31   : > { %s3919_s0 = scalar_lea.vmem %s4264_s13, %s3386_s28  ;;  %s3929_s3 = scalar_lea.vmem %s4218_s15, %s3391_s9 }
  0x32   : > { %s871_s17 = scalar_lea.vmem %s4266_s22, %s3862_s23  ;;  %s4267_s13 = sld [smem:[#allocation26_spill]] }
  0x34   : > { %p3321_p7 = scmp.ne.s32.totalorder %s4269_s5, 0 }
  0x35   : > { %s3946_s14 = scalar_lea.vmem %s4268_s8, %s3304_s24  ;;  %v883_v0 = vld [vmem:[%s811_s27] sm:$0xff] (!%p3321_p7)  ;;  %s4270_s6 = sld [smem:[#allocation13_spill]] (!%p3321_p7)  ;;  %vm887_vm0 = vcmask (!%p3321_p7), 261120  }
  0x36   : > { %882 = sbr.rel (%p3321_p7) target bundleno = 63 (0x3f), region = 100  ;;  %v884_v2 = vmul.f32 (!%p3321_p7), 5.656854, %v883_v0 }
  0x38   : > { %s874_s12 = scalar_lea.vmem %s4267_s13, %s3862_s23 }
  0x3b   : > { %v885_v1 = vld [vmem:[%s4270_s6] sm:$0xff] (!%p3321_p7) }
  0x3c   : > { %v886_v3 = vadd.f32 (!%p3321_p7), %v885_v1, %v884_v2 }
  0x3e   : > { %888 = vst.msk [vmem:[#allocation2] sm:$0xff] %vm887_vm0, %v886_v3 }
  0x3f PF: > { %s4271_s2 = sld [smem:[#allocation9_spill]]  ;;  %vm922_vm1 = vcmask 261120   ;;  %v3725_v6 = vmov 0.0   ;;  %vm3726_vm2 = vmmov 0   ;;  %v1223_v9 = vld [vmem:[%s3882_s25 + $0x8] sm:$0xff]  ;;  %v1225_v11 = vld [vmem:[%s3882_s25 + $0x18] sm:$0xff]  ;;  %s4276_s26 = scalar_lea.vmem %s4214_s11, %s3862_s23 }
  0x40   : > { %3454 = vmatprep.subr.mxu0 %v3725_v6  ;;  %3469 = vmatprep.subr.mxu1 %v3725_v6  ;;  %v1222_v12 = vld [vmem:[%s3882_s25] sm:$0xff]  ;;  %v1547_v13 = vld [vmem:[%s3892_s21 + $0x8] sm:$0xff]  ;;  %v1224_v14 = vld [vmem:[%s3882_s25 + $0x10] sm:$0xff]  ;;  %s4272_s8 = sld [smem:[#allocation10_spill]]  ;;  %s4273_s13 = sld [smem:[#allocation11_spill]]  ;;  %vm1871_vm3 = vcmask 64512  }
  0x41   : > { %3456 = vmatprep.mubr.msk.f32.mxu0 %vm3726_vm2, %v3725_v6  ;;  %3471 = vmatprep.mubr.msk.f32.mxu1 %vm3726_vm2, %v3725_v6  ;;  %v1549_v15 = vld [vmem:[%s3892_s21 + $0x18] sm:$0xff]  ;;  %v1546_v16 = vld [vmem:[%s3892_s21] sm:$0xff]  ;;  %v1548_v17 = vld [vmem:[%s3892_s21 + $0x10] sm:$0xff]  ;;  %s4274_s27 = sld [smem:[#allocation14_spill]]  ;;  %s4279_s9 = sld [smem:[#allocation24_spill]]  ;;  %vm2954_vm4 = vcmask 523264  }
  0x42   : > { %v3347_v44 = vld [vmem:[%s3897_s1 + $0x1] ss:$0 sm:$0xff]  ;;  %v3346_v60 = vld [vmem:[%s3897_s1] ss:$0 sm:$0xff]  ;;  %s4277_s20 = sld [smem:[#allocation22_spill]] }
  0x45   : > { %v890_v4 = vld [vmem:[%s4271_s2] sm:$0xff]  ;;  %v893_v5 = vld [vmem:[%s4271_s2 + $0x18] sm:$0xff]  ;;  %v891_v8 = vld [vmem:[%s4271_s2 + $0x8] sm:$0xff] }
  0x46   : > { %3455 = vmatpush3.xpose.msk.msra.mxu0 %vm922_vm1, %v890_v4  ;;  %3470 = vmatpush3.xpose.msk.msra.mxu1 %vm922_vm1, %v893_v5  ;;  %v3958_v7 = vld [vmem:[#allocation2] sm:$0xff]  ;;  %v892_v10 = vld [vmem:[%s4271_s2 + $0x10] sm:$0xff] }
  0x47   : > { %3459 = vmatprep.subr.mxu0 %v3725_v6  ;;  %3479 = vmatprep.subr.mxu1 %v3725_v6  ;;  %v3323_v22 = vld [vmem:[%s4272_s8 + $0x1] ss:$0 sm:$0xff]  ;;  %v3325_v24 = vld [vmem:[%s4272_s8 + $0x3] ss:$0 sm:$0xff]  ;;  %v3322_v35 = vld [vmem:[%s4272_s8] ss:$0 sm:$0xff]  ;;  %s4280_s30 = scalar_lea.vmem %s4279_s9, %s3862_s23 }
  0x48   : > { %v3335_v23 = vld [vmem:[%s4273_s13 + $0x1] ss:$0 sm:$0xff]  ;;  %v3337_v33 = vld [vmem:[%s4273_s13 + $0x3] ss:$0 sm:$0xff]  ;;  %v3334_v39 = vld [vmem:[%s4273_s13] ss:$0 sm:$0xff]  ;;  %s4278_s4 = scalar_lea.vmem %s4277_s20, %s3862_s23 }
  0x49   : > { %3457 = vmatmul.mubr.msk.f32.vlgmr.msra.gmra.mrb[0].mxu0 %vm922_vm1, %v3958_v7  ;;  %3472 = vmatmul.mubr.msk.f32.vlgmr.msra.gmra.mrb[0].mxu1 %vm922_vm1, %v3958_v7  ;;  %v3324_v45 = vld [vmem:[%s4272_s8 + $0x2] ss:$0 sm:$0xff] }
  0x4a   : > { %3460 = vmatpush3.xpose.msk.msra.mxu0 %vm922_vm1, %v891_v8  ;;  %3480 = vmatpush3.xpose.msk.msra.mxu1 %vm922_vm1, %v1223_v9  ;;  %v3336_v48 = vld [vmem:[%s4273_s13 + $0x2] ss:$0 sm:$0xff] }
  0x4b   : > { %3461 = vmatprep.mubr.msk.f32.mxu0 %vm3726_vm2, %v3725_v6  ;;  %3481 = vmatprep.mubr.msk.f32.mxu1 %vm3726_vm2, %v3725_v6  ;;  %v1870_v8 = vld [vmem:[%s4274_s27] sm:$0xff]  ;;  %s4283_s27 = sld [smem:[#allocation3_spill]] }
  0x4c   : > { %3464 = vmatprep.subr.mxu0 %v3725_v6  ;;  %3489 = vmatprep.subr.mxu1 %v3725_v6 }
  0x4d   : > { %3462 = vmatmul.mubr.msk.f32.vlgmr.msra.gmra.mrb[2].mxu0 %vm922_vm1, %v3958_v7  ;;  %3482 = vmatmul.mubr.msk.f32.vlgmr.msra.gmra.mrb[2].mxu1 %vm922_vm1, %v3958_v7 }
  0x4e   : > { %3465 = vmatpush3.xpose.msk.msra.mxu0 %vm922_vm1, %v892_v10  ;;  %3466 = vmatprep.mubr.msk.f32.mxu0 %vm3726_vm2, %v3725_v6 }
  0x4f   : > { %3490 = vmatpush3.xpose.msk.msra.mxu1 %vm922_vm1, %v1225_v11  ;;  %3474 = vmatprep.subr.mxu0 %v3725_v6 }
  0x50   : > { %3491 = vmatprep.mubr.msk.f32.mxu1 %vm3726_vm2, %v3725_v6  ;;  %3499 = vmatprep.subr.mxu1 %v3725_v6 }
  0x51   : > { %3467 = vmatmul.mubr.msk.f32.vlgmr.msra.gmra.mrb[4].mxu0 %vm922_vm1, %v3958_v7  ;;  %p3383_p8 = scmp.ne.s32.totalorder %s4283_s27, 1 }
  0x52   : > { %3475 = vmatpush3.xpose.msk.msra.mxu0 %vm922_vm1, %v1222_v12  ;;  %3492 = vmatmul.mubr.msk.f32.vlgmr.msra.gmra.mrb[4].mxu1 %vm922_vm1, %v3958_v7 }
  0x53   : > { %3476 = vmatprep.mubr.msk.f32.mxu0 %vm3726_vm2, %v3725_v6  ;;  %3484 = vmatprep.subr.mxu0 %v3725_v6 }
  0x54   : > { %3500 = vmatpush3.xpose.msk.msra.mxu1 %vm922_vm1, %v1547_v13  ;;  %3501 = vmatprep.mubr.msk.f32.mxu1 %vm3726_vm2, %v3725_v6 }
  0x55   : > { %3477 = vmatmul.mubr.msk.f32.vlgmr.msra.gmra.mrb[6].mxu0 %vm922_vm1, %v3958_v7  ;;  %3509 = vmatprep.subr.mxu1 %v3725_v6 }
  0x56   : > { %3485 = vmatpush3.xpose.msk.msra.mxu0 %vm922_vm1, %v1224_v14  ;;  %3486 = vmatprep.mubr.msk.f32.mxu0 %vm3726_vm2, %v3725_v6 }
  0x57   : > { %3502 = vmatmul.mubr.msk.f32.vlgmr.msra.gmra.mrb[6].mxu1 %vm922_vm1, %v3958_v7  ;;  %3494 = vmatprep.subr.mxu0 %v3725_v6 }
  0x58   : > { %3511 = vmatprep.mubr.msk.f32.mxu1 %vm3726_vm2, %v3725_v6  ;;  %3510 = vmatpush3.xpose.msk.msra.mxu1 %vm922_vm1, %v1549_v15 }
  0x59   : > { %3487 = vmatmul.mubr.msk.f32.vlgmr.msra.gmra.mrb[8].mxu0 %vm922_vm1, %v3958_v7  ;;  %3519 = vmatprep.subr.mxu1 %v3725_v6 }
  0x5a   : > { %3496 = vmatprep.mubr.msk.f32.mxu0 %vm3726_vm2, %v3725_v6  ;;  %3495 = vmatpush3.xpose.msk.msra.mxu0 %vm922_vm1, %v1546_v16 }
  0x5b   : > { %3512 = vmatmul.mubr.msk.f32.vlgmr.msra.gmra.mrb[8].mxu1 %vm922_vm1, %v3958_v7  ;;  %3504 = vmatprep.subr.mxu0 %v3725_v6 }
  0x5c   : > { %3521 = vmatprep.mubr.msk.f32.mxu1 %vm3726_vm2, %v3725_v6 }
  0x5d   : > { %3497 = vmatmul.mubr.msk.f32.vlgmr.msra.gmra.mrb[10].mxu0 %vm922_vm1, %v3958_v7 }
  0x5e   : > { %3505 = vmatpush3.xpose.msk.msra.mxu0 %vm922_vm1, %v1548_v17  ;;  %3506 = vmatprep.mubr.msk.f32.mxu0 %vm3726_vm2, %v3725_v6 }
  0x5f   : > { %3514 = vmatprep.subr.mxu0 %v3725_v6 }
  0x61   : > { %3507 = vmatmul.mubr.msk.f32.vlgmr.msra.gmra.mrb[12].mxu0 %vm922_vm1, %v3958_v7 }
  0x62   : > { %3516 = vmatprep.mubr.msk.f32.mxu0 %vm3726_vm2, %v3725_v6 }
 0x11c   : > { %v995_v18 = vpop.f32.mrb[0].mxu0  ;;  %v1214_v19 = vpop.f32.mrb[0].mxu1 }
 0x11d   : > { %v3458_v20 = vpop.f32.mrb[1].mxu0  ;;  %v3473_v21 = vpop.f32.mrb[1].mxu1  ;;  %v1215_v31 = vadd.f32 %v3325_v24, %v1214_v19  ;;  %v996_v42 = vadd.f32 %v3322_v35, %v995_v18 }
 0x11f   : > { %v1221_v41 = vmul.f32 0.35355338, %v1215_v31  ;;  %v1218_v52 = vmul.f32 0.35355338, %v996_v42 }
 0x120   : > { %v1068_v25 = vpop.f32.mrb[2].mxu0  ;;  %v1396_v26 = vpop.f32.mrb[2].mxu1 }
 0x121   : > { %v1069_v27 = vadd.f32 %v3323_v22, %v1068_v25  ;;  %v1397_v28 = vadd.f32 %v3335_v23, %v1396_v26  ;;  %v3463_v29 = vpop.f32.mrb[3].mxu0  ;;  %v3483_v30 = vpop.f32.mrb[3].mxu1 }
 0x123   : > { %v1219_v32 = vmul.f32 0.35355338, %v1069_v27  ;;  %3520 = vmatpush3.xpose.msk.msra.mxu1 %vm1871_vm3, %v1397_v28 }
 0x124   : > { %v1141_v34 = vpop.f32.mrb[4].mxu0  ;;  %3529 = vmatprep.subr.mxu1 %v3725_v6 }
 0x125   : > { %v3468_v36 = vpop.f32.mrb[5].mxu0  ;;  %v1542_v37 = vpop.f32.mrb[4].mxu1  ;;  %v1142_v53 = vadd.f32 %v3324_v45, %v1141_v34  ;;  %v3348_v45 = vld [vmem:[%s3897_s1 + $0x2] ss:$0 sm:$0xff] }
 0x126   : > { %v1543_v38 = vadd.f32 %v3337_v33, %v1542_v37  ;;  %3522 = vmatmul.mubr.msk.f32.vlgmr.msra.gmra.mrb[10].mxu1 %vm1871_vm3, %v1219_v32  ;;  %v3493_v40 = vpop.f32.mrb[5].mxu1 }
 0x127   : > { %3531 = vmatprep.mubr.msk.f32.mxu1 %vm3726_vm2, %v3725_v6  ;;  %v1220_v57 = vmul.f32 0.35355338, %v1142_v53 }
 0x128   : > { %v1323_v43 = vpop.f32.mrb[6].mxu0  ;;  %3530 = vmatpush3.xpose.msk.msra.mxu1 %vm1871_vm3, %v1543_v38 }
 0x129   : > { %v1324_v46 = vadd.f32 %v3334_v39, %v1323_v43  ;;  %v3478_v47 = vpop.f32.mrb[7].mxu0  ;;  %3539 = vmatprep.subr.mxu1 %v3725_v6 }
 0x12a   : > { %v1720_v49 = vpop.f32.mrb[6].mxu1 }
 0x12b   : > { %3515 = vmatpush3.xpose.msk.msra.mxu0 %vm1871_vm3, %v1324_v46  ;;  %3532 = vmatmul.mubr.msk.f32.vlgmr.msra.gmra.mrb[12].mxu1 %vm1871_vm3, %v1221_v41  ;;  %v1721_v50 = vadd.f32 %v3347_v44, %v1720_v49  ;;  %v3503_v51 = vpop.f32.mrb[7].mxu1  ;;  %v3349_v49 = vld [vmem:[%s3897_s1 + $0x3] ss:$0 sm:$0xff] }
 0x12c   : > { %v1469_v54 = vpop.f32.mrb[8].mxu0  ;;  %3524 = vmatprep.subr.mxu0 %v3725_v6  ;;  %3541 = vmatprep.mubr.msk.f32.mxu1 %vm3726_vm2, %v3725_v6 }
 0x12d   : > { %v1470_v55 = vadd.f32 %v3336_v48, %v1469_v54  ;;  %v3488_v56 = vpop.f32.mrb[9].mxu0  ;;  %3540 = vmatpush3.msra.mxu1 %v1721_v50 }
 0x12e   : > { %3517 = vmatmul.mubr.msk.f32.vlgmr.msra.gmra.mrb[14].mxu0 %vm1871_vm3, %v1218_v52  ;;  %3549 = vmatprep.subr.mxu1 %v3725_v6  ;;  %v4074_v58 = vpop.f32.mrb[8].mxu1 }
 0x12f   : > { %3525 = vmatpush3.xpose.msk.msra.mxu0 %vm1871_vm3, %v1470_v55  ;;  %3526 = vmatprep.mubr.msk.f32.mxu0 %vm3726_vm2, %v3725_v6  ;;  %v3513_v59 = vpop.f32.mrb[9].mxu1  ;;  %v1867_v53 = vadd.f32 %v3349_v49, %v4074_v58  ;;  %v2513_v58 = vld [vmem:[%s3902_s18 + $0x8] sm:$0xff]  ;;  %v3375_v49 = vld [vmem:[%s4276_s26] ss:$0 sm:$0xff] }
 0x130   : > { %3534 = vmatprep.subr.mxu0 %v3725_v6  ;;  %v1647_v61 = vpop.f32.mrb[10].mxu0  ;;  %v2514_v59 = vld [vmem:[%s3902_s18 + $0x10] sm:$0xff] }
 0x131   : > { %v1648_v62 = vadd.f32 %v3346_v60, %v1647_v61  ;;  %v3498_v63 = vpop.f32.mrb[11].mxu0 }
 0x132   : > { %3527 = vmatmul.mubr.msk.f32.vlgmr.msra.gmra.mrb[16].mxu0 %vm1871_vm3, %v1220_v57  ;;  %v2512_v57 = vld [vmem:[%s3902_s18] sm:$0xff] }
 0x133   : > { %3536 = vmatprep.mubr.msk.f32.mxu0 %vm3726_vm2, %v3725_v6  ;;  %3535 = vmatpush3.msra.mxu0 %v1648_v62  ;;  %v2515_v62 = vld [vmem:[%s3902_s18 + $0x18] sm:$0xff]  ;;  %s4275_s18 = scalar_lea.vmem %s4213_s10, %s3862_s23 }
 0x134   : > { %v4077_v0 = vpop.f32.mrb[12].mxu0  ;;  %3544 = vmatprep.subr.mxu0 %v3725_v6 }
 0x135   : > { %v3508_v1 = vpop.f32.mrb[13].mxu0  ;;  %v1794_v48 = vadd.f32 %v3348_v45, %v4077_v0 }
 0x1f9   : > { %v2020_v2 = vpop.f32.mrb[10].mxu1 }
 0x1fa   : > { %v3523_v3 = vpop.f32.mrb[11].mxu1  ;;  %v2021_v12 = vadd.f32 %v2020_v2, %v1870_v8 }
 0x1fc   : > { %v2179_v18 = vsel %vm1871_vm3, %v2021_v12, -inf }
 0x1fe   : > { %v2172_v4 = vpop.f32.mrb[12].mxu1 }
 0x1ff   : > { %v3533_v5 = vpop.f32.mrb[13].mxu1  ;;  %v2173_v17 = vadd.f32 %v2172_v4, %v1870_v8 }
 0x201   : > { %v1944_v9 = vpop.f32.mrb[14].mxu0  ;;  %v2185_v20 = vsel %vm1871_vm3, %v2173_v17, -inf }
 0x202   : > { %v1945_v10 = vadd.f32 %v1944_v9, %v1870_v8  ;;  %v3518_v11 = vpop.f32.mrb[15].mxu0 }
 0x204   : > { %v2176_v13 = vsel %vm1871_vm3, %v1945_v10, -inf }
 0x205   : > { %2177 = vmax.xlane.f32.xlu0 %v2176_v13  ;;  %v2096_v14 = vpop.f32.mrb[16].mxu0 }
 0x206   : > { %v2097_v15 = vadd.f32 %v2096_v14, %v1870_v8  ;;  %v3528_v16 = vpop.f32.mrb[17].mxu0 }
 0x208   : > { %v2182_v19 = vsel %vm1871_vm3, %v2097_v15, -inf }
 0x209   : > { %2180 = vmax.xlane.f32.xlu0 %v2179_v18  ;;  %2183 = vmax.xlane.f32.xlu1 %v2182_v19 }
 0x20d   : > { %2186 = vmax.xlane.f32.xlu1 %v2185_v20 }
 0x292   : > { %v2178_v21 = vpop.xlane.xlu0 %2177 }
 0x293   : > { %v2188_v22 = vsub.f32 %v1945_v10, %v2178_v21 }
 0x295   : > { %v2192_v23 = vmul.f32 1.442695, %v2188_v22 }
 0x296   : > { %v2181_v24 = vpop.xlane.xlu0 %2180  ;;  %v2184_v25 = vpop.xlane.xlu1 %2183 }
 0x297   : > { %3665 = vpow2.f32 %v2192_v23  ;;  %v2189_v26 = vsub.f32 %v2021_v12, %v2181_v24  ;;  %v2190_v27 = vsub.f32 %v2097_v15, %v2184_v25 }
 0x299   : > { %v2194_v28 = vmul.f32 1.442695, %v2189_v26  ;;  %v2196_v29 = vmul.f32 1.442695, %v2190_v27 }
 0x29a   : > { %v2187_v30 = vpop.xlane.xlu1 %2186 }
 0x29b   : > { %3667 = vpow2.f32 %v2194_v28  ;;  %v2191_v31 = vsub.f32 %v2173_v17, %v2187_v30  ;;  %v2854_v30 = vld [vmem:[%s3919_s0] sm:$0xff] }
 0x29c   : > { %3669 = vpow2.f32 %v2196_v29 }
 0x29d   : > { %v2198_v32 = vmul.f32 1.442695, %v2191_v31  ;;  %v2855_v31 = vld [vmem:[%s3919_s0 + $0x8] sm:$0xff] }
 0x29f   : > { %3671 = vpow2.f32 %v2198_v32  ;;  %v3605_v32 = vpack.c.bf16 %v2855_v31, %v2854_v30 }
 0x2a1   : > { %v3666_v33 = vpop.eup %3665 }
 0x2a2   : > { %v2200_v34 = vsel %vm1871_vm3, %v3666_v33, 0.0 }
 0x2a3   : > { %2201 = vadd.xlane.f32.xlu0 %v2200_v34  ;;  %v2857_v34 = vld [vmem:[%s3919_s0 + $0x18] sm:$0xff] }
 0x2a5   : > { %v3668_v35 = vpop.eup %3667 }
 0x2a6   : > { %v3670_v36 = vpop.eup %3669  ;;  %v2203_v37 = vsel %vm1871_vm3, %v3668_v35, 0.0 }
 0x2a7   : > { %2204 = vadd.xlane.f32.xlu1 %v2203_v37  ;;  %v2206_v38 = vsel %vm1871_vm3, %v3670_v36, 0.0  ;;  %v2940_v37 = vld [vmem:[%s3929_s3 + $0x8] sm:$0xff] }
 0x2a8   : > { %2207 = vadd.xlane.f32.xlu0 %v2206_v38  ;;  %v2941_v38 = vld [vmem:[%s3929_s3 + $0x10] sm:$0xff] }
 0x2a9   : > { %v3672_v39 = vpop.eup %3671 }
 0x2aa   : > { %v2209_v40 = vsel %vm1871_vm3, %v3672_v39, 0.0 }
 0x2ab   : > { %2210 = vadd.xlane.f32.xlu1 %v2209_v40  ;;  %v2942_v40 = vld [vmem:[%s3929_s3 + $0x18] sm:$0xff] }
 0x330   : > { %v2202_v41 = vpop.xlane.xlu0 %2201 }
 0x331   : > { %3673 = vrcp.f32 %v2202_v41  ;;  %v3614_v41 = vpack.c.bf16 %v2942_v40, %v2941_v38 }
 0x334   : > { %v2205_v42 = vpop.xlane.xlu1 %2204 }
 0x335   : > { %v2208_v43 = vpop.xlane.xlu0 %2207  ;;  %3675 = vrcp.f32 %v2205_v42  ;;  %v2943_v42 = vld [vmem:[%s3929_s3 + $0x20] sm:$0xff] }
 0x336   : > { %3677 = vrcp.f32 %v2208_v43  ;;  %v2944_v43 = vld [vmem:[%s3929_s3 + $0x28] sm:$0xff] }
 0x338   : > { %v2211_v44 = vpop.xlane.xlu1 %2210 }
 0x339   : > { %3679 = vrcp.f32 %v2211_v44  ;;  %v3617_v44 = vpack.c.bf16 %v2944_v43, %v2943_v42 }
 0x33b   : > { %v3674_v46 = vpop.eup %3673 }
 0x33c   : > { %v2213_v47 = vmul.f32 %v3674_v46, %v3666_v33  ;;  %v2856_v33 = vld [vmem:[%s3919_s0 + $0x10] sm:$0xff] }
 0x33e   : > { %3537 = vmatmul.mubr.msk.f32.vlgmr.msra.gmra.mrb[18].mxu0 %vm1871_vm3, %v2213_v47 }
 0x33f   : > { %v3676_v50 = vpop.eup %3675  ;;  %3545 = vmatpush3.msra.mxu0 %v1794_v48  ;;  %3546 = vmatprep.mubr.msk.f32.mxu0 %vm3726_vm2, %v3725_v6 }
 0x340   : > { %v3678_v51 = vpop.eup %3677  ;;  %v2215_v52 = vmul.f32 %v3676_v50, %v3668_v35  ;;  %3554 = vmatprep.subr.mxu0 %v3725_v6  ;;  %v3608_v35 = vpack.c.bf16 %v2857_v34, %v2856_v33 }
 0x341   : > { %v2217_v54 = vmul.f32 %v3678_v51, %v3670_v36  ;;  %v2939_v36 = vld [vmem:[%s3929_s3] sm:$0xff] }
 0x342   : > { %3542 = vmatmul.mubr.msk.f32.vlgmr.msra.gmra.mrb[14].mxu1 %vm1871_vm3, %v2215_v52  ;;  %v3376_v51 = vld [vmem:[%s4278_s4] ss:$0 sm:$0xff] }
 0x343   : > { %v3680_v55 = vpop.eup %3679  ;;  %3547 = vmatmul.mubr.msk.f32.vlgmr.msra.gmra.mrb[20].mxu0 %vm1871_vm3, %v2217_v54  ;;  %3550 = vmatpush3.msra.mxu1 %v1867_v53  ;;  %v2945_v54 = vld [vmem:[%s3929_s3 + $0x30] sm:$0xff] }
 0x344   : > { %v2219_v56 = vmul.f32 %v3680_v55, %v3672_v39  ;;  %3551 = vmatprep.mubr.msk.f32.mxu1 %vm3726_vm2, %v3725_v6  ;;  %3556 = vmatprep.mubr.msk.f32.mxu0 %vm3726_vm2, %v3725_v6  ;;  %v3611_v39 = vpack.c.bf16 %v2940_v37, %v2939_v36  ;;  %v2946_v55 = vld [vmem:[%s3929_s3 + $0x38] sm:$0xff] }
 0x345   : > { %3559 = vmatprep.subr.mxu1 %v3725_v6  ;;  %3555 = vmatpush3.msra.mxu0 %v2512_v57  ;;  %v3377_v57 = vld [vmem:[%s4280_s30] ss:$0 sm:$0xff] }
 0x346   : > { %3552 = vmatmul.mubr.msk.f32.vlgmr.msra.gmra.mrb[16].mxu1 %vm1871_vm3, %v2219_v56  ;;  %3564 = vmatprep.subr.mxu0 %v3725_v6  ;;  %v3620_v56 = vpack.c.bf16 %v2946_v55, %v2945_v54 }
 0x347   : > { %3561 = vmatprep.mubr.msk.f32.mxu1 %vm3726_vm2, %v3725_v6  ;;  %3560 = vmatpush3.msra.mxu1 %v2513_v58 }
 0x348   : > { %3569 = vmatprep.subr.mxu1 %v3725_v6 }
 0x411   : > { %v2289_v60 = vpop.f32.mrb[18].mxu0 }
 0x412   : > { %v3538_v61 = vpop.f32.mrb[19].mxu0  ;;  %3557 = vmatmul.mubr.msk.f32.vlgmr.msra.gmra.mrb[22].mxu0 %vm1871_vm3, %v2289_v60 }
 0x413   : > { %3565 = vmatpush3.msra.mxu0 %v2514_v59  ;;  %3566 = vmatprep.mubr.msk.f32.mxu0 %vm3726_vm2, %v3725_v6 }
 0x415   : > { %v2362_v63 = vpop.f32.mrb[14].mxu1 }
 0x416   : > { %v2435_v0 = vpop.f32.mrb[20].mxu0  ;;  %v3543_v1 = vpop.f32.mrb[15].mxu1  ;;  %3562 = vmatmul.mubr.msk.f32.vlgmr.msra.gmra.mrb[18].mxu1 %vm1871_vm3, %v2362_v63 }
 0x417   : > { %v3548_v2 = vpop.f32.mrb[21].mxu0  ;;  %3567 = vmatmul.mubr.msk.f32.vlgmr.msra.gmra.mrb[24].mxu0 %vm1871_vm3, %v2435_v0  ;;  %3570 = vmatpush3.msra.mxu1 %v2515_v62  ;;  %v3379_v62 = vld [vmem:[%s868_s7] ss:$0 sm:$0xff] }
 0x418   : > { %3571 = vmatprep.mubr.msk.f32.mxu1 %vm3726_vm2, %v3725_v6  ;;  %3582 = vmatprep.mubr.msk.f32.mxu0 %vm3726_vm2, %v3725_v6 }
 0x419   : > { %v2508_v3 = vpop.f32.mrb[16].mxu1 }
 0x41a   : > { %v3553_v4 = vpop.f32.mrb[17].mxu1  ;;  %3572 = vmatmul.mubr.msk.f32.vlgmr.msra.gmra.mrb[20].mxu1 %vm1871_vm3, %v2508_v3 }
 0x41b   : > { %3601 = vmatprep.mubr.msk.f32.mxu1 %vm3726_vm2, %v3725_v6  ;;  %v3374_v6 = vld [vmem:[%s4275_s18] ss:$0 sm:$0xff] }
 0x4e5   : > { %v2585_v5 = vpop.f32.mrb[22].mxu0 }
 0x4e6   : > { %v3558_v8 = vpop.f32.mrb[23].mxu0  ;;  %v2808_v10 = vsel %vm922_vm1, %v2585_v5, 0.0 }
 0x4e9   : > { %v2658_v9 = vpop.f32.mrb[18].mxu1 }
 0x4ea   : > { %v2809_v11 = vsel %vm922_vm1, %v2658_v9, 0.0  ;;  %v2731_v12 = vpop.f32.mrb[24].mxu0  ;;  %v3563_v13 = vpop.f32.mrb[19].mxu1 }
 0x4eb   : > { %v2810_v14 = vadd.f32 %v2809_v11, %v2808_v10  ;;  %v3568_v15 = vpop.f32.mrb[25].mxu0  ;;  %v2811_v16 = vsel %vm922_vm1, %v2731_v12, 0.0 }
 0x4ec   : > { %v3381_v15 = vld [vmem:[%s871_s17] ss:$0 sm:$0xff] }
 0x4ed   : > { %v2812_v17 = vadd.f32 %v2811_v16, %v2810_v14  ;;  %v2804_v18 = vpop.f32.mrb[20].mxu1 }
 0x4ee   : > { %v2813_v19 = vsel %vm922_vm1, %v2804_v18, 0.0  ;;  %v3573_v20 = vpop.f32.mrb[21].mxu1 }
 0x4ef   : > { %v2814_v21 = vadd.f32 %v2813_v19, %v2812_v17  ;;  %v3382_v17 = vld [vmem:[%s874_s12] ss:$0 sm:$0xff] }
 0x4f1   : > { %v2822_v22 = vadd.f32 %v3374_v6, %v2814_v21 }
 0x4f3   : > { %v2823_v23 = vadd.f32 %v2822_v22, %v3958_v7  ;;  %v3727_v7 = vmov 0.0|0.0  }
 0x4f4   : > { %3604 = vmatprep.subr.bf16.mxu0 %v3727_v7  ;;  %3610 = vmatprep.subr.bf16.mxu1 %v3727_v7 }
 0x4f5   : > { %v2826_v24 = vsel %vm922_vm1, %v2823_v23, 0.0  ;;  %3606 = vmatpush3.bf16.msra.mxu0 %v3605_v32  ;;  %3612 = vmatpush3.bf16.msra.mxu1 %v3611_v39 }
 0x4f6   : > { %2827 = vadd.xlane.f32.xlu0 %v2826_v24  ;;  %3607 = vmatprep.subr.bf16.mxu0 %v3727_v7 }
 0x4f7   : > { %3613 = vmatprep.subr.bf16.mxu1 %v3727_v7 }
 0x4f9   : > { %3609 = vmatpush3.bf16.msra.mxu0 %v3608_v35  ;;  %3615 = vmatpush3.bf16.msra.mxu1 %v3614_v41 }
 0x4fa   : > { %3616 = vmatprep.subr.bf16.mxu1 %v3727_v7 }
 0x4fd   : > { %3618 = vmatpush3.bf16.msra.mxu1 %v3617_v44 }
 0x4fe   : > { %3619 = vmatprep.subr.bf16.mxu1 %v3727_v7 }
 0x501   : > { %3621 = vmatpush3.bf16.msra.mxu1 %v3620_v56 }
 0x583   : > { %v2828_v25 = vpop.xlane.xlu0 %2827 }
 0x584   : > { %v2830_v26 = vmul.f32 0.03125, %v2828_v25 }
 0x586   : > { %v2831_v27 = vsub.f32 %v2823_v23, %v2830_v26 }
 0x588   : > { %v2832_v28 = vmul.f32 %v2831_v27, %v2831_v27 }
 0x58a   : > { %v2833_v29 = vsel %vm922_vm1, %v2832_v28, 0.0 }
 0x58b   : > { %2834 = vadd.xlane.f32.xlu1 %v2833_v29 }
 0x618   : > { %v2835_v45 = vpop.xlane.xlu1 %2834 }
 0x619   : > { %v2836_v46 = vmul.f32 0.03125, %v2835_v45 }
 0x61b   : > { %v2837_v47 = vadd.f32 1e-05, %v2836_v46 }
 0x61d   : > { %3681 = vrsqrt.f32 %v2837_v47 }
 0x627   : > { %v3682_v48 = vpop.eup %3681 }
 0x628   : > { %v2839_v50 = vmul.f32 %v3682_v48, %v2831_v27 }
 0x62a   : > { %v2846_v52 = vmul.f32 %v3375_v49, %v2839_v50 }
 0x62c   : > { %v2853_v53 = vadd.f32 %v3376_v51, %v2846_v52 }
 0x62e   : > { %3583 = vmatmul.mubr.msk.f32.vlgmr.msra.gmra.mrb[26].mxu0 %vm922_vm1, %v2853_v53 }
 0x701   : > { %v2934_v58 = vpop.f32.mrb[26].mxu0 }
 0x702   : > { %v2935_v59 = vadd.f32 %v3377_v57, %v2934_v58  ;;  %v3584_v60 = vpop.f32.mrb[27].mxu0 }
 0x704   : > { %v2938_v61 = vmax.f32 %v2935_v59, 0.0 }
 0x706   : > { %3602 = vmatmul.mubr.msk.f32.vlgmr.msra.gmra.mrb[22].mxu1 %vm2954_vm4, %v2938_v61 }
 0x7d9   : > { %v3024_v63 = vpop.f32.mrb[22].mxu1 }
 0x7da   : > { %v3025_v0 = vadd.f32 %v3379_v62, %v3024_v63  ;;  %v3603_v1 = vpop.f32.mrb[23].mxu1 }
 0x7dc   : > { %v3028_v2 = vadd.f32 %v3025_v0, %v2853_v53 }
 0x7de   : > { %v3031_v3 = vsel %vm922_vm1, %v3028_v2, 0.0 }
 0x7df   : > { %3032 = vadd.xlane.f32.xlu0 %v3031_v3 }
 0x86c   : > { %v3033_v4 = vpop.xlane.xlu0 %3032 }
 0x86d   : > { %v3034_v5 = vmul.f32 0.03125, %v3033_v4 }
 0x86f   : > { %v3035_v8 = vsub.f32 %v3028_v2, %v3034_v5 }
 0x871   : > { %v3036_v9 = vmul.f32 %v3035_v8, %v3035_v8 }
 0x873   : > { %v3037_v10 = vsel %vm922_vm1, %v3036_v9, 0.0 }
 0x874   : > { %3038 = vadd.xlane.f32.xlu1 %v3037_v10 }
 0x901   : > { %v3039_v11 = vpop.xlane.xlu1 %3038 }
 0x902   : > { %v3040_v12 = vmul.f32 0.03125, %v3039_v11 }
 0x904   : > { %v3041_v13 = vadd.f32 1e-05, %v3040_v12 }
 0x906   : > { %3683 = vrsqrt.f32 %v3041_v13 }
 0x910   : > { %v3684_v14 = vpop.eup %3683 }
 0x911   : > { %v3043_v16 = vmul.f32 %v3684_v14, %v3035_v8  ;;  %3062 = sbr.rel (%p3383_p8) target bundleno = 2328 (0x918), region = 104 }
 0x913   : > { %v3050_v18 = vmul.f32 %v3381_v15, %v3043_v16 }
 0x915   : > { %v3057_v19 = vadd.f32 %v3382_v17, %v3050_v18 }
 0x917   : > { %3058 = vst.msk [vmem:[#allocation2] sm:$0xff] %vm922_vm1, %v3057_v19  ;;  %3063 = vst.msk [vmem:[%s3946_s14] sm:$0xff] (!%p3383_p8), %vm922_vm1, %v3057_v19 }
 0x918 PF: > { %s4284_s25 = sld [smem:[#allocation6_spill]]  ;;  %s4285_s0 = sld [smem:[#allocation4_spill]] }
 0x919   : > { %s4286_s30 = sld [smem:[#allocation5_spill]]  ;;  %s4287_s20 = sld [smem:[#allocation7_spill]] }
 0x91a   : > { %s4288_s21 = sld [smem:[#allocation8_spill]] }
 0x91e   : > { %s29_s1 = sadd.s32 1, %s4284_s25  }
 0x91f   : > { %p26_p9 = scmp.ge.s32.totalorder %s29_s1, 6  }
 0x921   :  { %28 = sbr.rel (!%p26_p9) target bundleno = 17 (0x11), region = 182 }

</bundles_post_ra>
